<compile_context>
chip_gen: v7x
topology: tpu7x:2x2x1
jax: 0.10.0
libtpu: 0.0.40
codegen_flags: <defaults>
</compile_context>

<pallas_src>
import functools
import math

import jax
import jax.numpy as jnp
from jax.experimental import pallas as pl
from jax.experimental.pallas import tpu as pltpu


# ----------------------------------------------------------------------------
# Fused kernel: (encoder+PE+QKV folded) matmul -> per-head attention -> out
# ----------------------------------------------------------------------------
def _dstan_fused_kernel(x_ref, wqkv_ref, addqkv_ref, bias_ref, wout_ref,
                        bout_ref, o_ref, *, num_heads, head_dim):
    f32 = jnp.float32
    bf16 = jnp.bfloat16
    HH = num_heads * head_dim

    # ---- fused encoder+PE+q|k|v projection: ONE (S,D)@(D,3*HH) MXU matmul ---
    x = x_ref[0]                                                  # (S, D) f32
    qkv = jnp.dot(x.astype(bf16), wqkv_ref[...],
                  preferred_element_type=f32)                     # (S, 3*HH)
    # add_comb carries encoder bias, positional encoding and q/k/v biases,
    # with the 1/sqrt(H) scale pre-folded into the q third; stage bf16 once.
    qkv = (qkv + addqkv_ref[...]).astype(bf16)                    # (S, 3*HH) bf16

    bias = bias_ref[...]                                          # (S, S) f32

    # ---- per-head attention, accumulated straight into the out projection ---
    out = bout_ref[...]                                           # (1, H) f32
    for h in range(num_heads):
        lo = h * head_dim
        q = qkv[:, lo:lo + head_dim]                  # (S, hd) bf16, pre-scaled
        k = qkv[:, HH + lo:HH + lo + head_dim]
        v = qkv[:, 2 * HH + lo:2 * HH + lo + head_dim]

        # q @ k^T without materialising a transpose (contract last dims).
        e = jax.lax.dot_general(q, k, (((1,), (1,)), ((), ())),
                                preferred_element_type=f32)       # (S, S) f32
        e = e + bias
        e = e - jnp.max(e, axis=-1, keepdims=True)
        p = jnp.exp(e)
        inv = pl.reciprocal(jnp.sum(p, axis=-1, keepdims=True), approx=True)
        attn = (p * inv).astype(bf16)
        # TODO(synk): attention dropout(p=0.6) omitted (eval-mode identity).
        ctx = jnp.dot(attn, v, preferred_element_type=f32)        # (S, hd)
        # per-head out-projection accumulation (static sublane-aligned slice)
        out = out + jnp.dot(ctx.astype(bf16),
                            wout_ref[lo:lo + head_dim, :],
                            preferred_element_type=f32)           # (S, H)

    o_ref[0] = out


# ----------------------------------------------------------------------------
# Wrapper
# ----------------------------------------------------------------------------
def dstan_forward(kparams, x, mask, *, num_heads, hidden_size):
    B, T, N, D = x.shape
    H = hidden_size
    S = T * N
    HH = num_heads * H

    # rows already in the attention's s = t*N + n order
    x_s = x.reshape(B, S, D)
    # additive mask bias (large finite negative -> no -inf/NaN hazard)
    bias = jnp.where(mask, jnp.float32(-1e30), jnp.float32(0.0))

    kern = functools.partial(_dstan_fused_kernel, num_heads=num_heads,
                             head_dim=H)

    def rep(shape):  # grid-invariant (broadcast) operand
        n = len(shape)
        return pl.BlockSpec(shape, lambda b, n=n: (0,) * n)

    cost = pl.CostEstimate(
        flops=int(2 * B * (S * D * 3 * HH
                           + num_heads * 2 * S * S * H
                           + S * HH * H)),
        transcendentals=int(B * num_heads * S * S),
        bytes_accessed=int(x_s.size * 4 + kparams["w_comb"].size * 2
                           + kparams["add_comb"].size * 4 + bias.size * 4
                           + kparams["out_w"].size * 2
                           + kparams["out_b"].size * 4 + B * S * H * 4),
    )

    out_s = pl.pallas_call(
        kern,
        out_shape=jax.ShapeDtypeStruct((B, S, H), jnp.float32),
        grid=(B,),
        in_specs=[
            pl.BlockSpec((1, S, D), lambda b: (b, 0, 0)),   # x
            rep((D, 3 * HH)),                               # w_comb   (bf16)
            rep((S, 3 * HH)),                               # add_comb (f32)
            rep((S, S)),                                    # mask bias (f32)
            rep((HH, H)),                                   # out_w    (bf16)
            rep((1, H)),                                    # out_b    (f32)
        ],
        out_specs=pl.BlockSpec((1, S, H), lambda b: (b, 0, 0)),
        compiler_params=pltpu.CompilerParams(dimension_semantics=("parallel",)),
        cost_estimate=cost,
    )(x_s, kparams["w_comb"], kparams["add_comb"], bias,
      kparams["out_w"], kparams["out_b"])

    # torch: out_flat.transpose(1,2).contiguous().view(B, N, T, heads*H) then
    # the out-projection; with the projection fused in-kernel this is exactly
    # a reinterpretation of the flattened s axis as (N, T).
    return out_s.reshape(B, N, T, H)


# ----------------------------------------------------------------------------
# Parameter construction
# ----------------------------------------------------------------------------
def make_positional_encoding(max_len, d_model):
    pos = jnp.arange(max_len, dtype=jnp.float32)[:, None]
    div = jnp.exp(
        jnp.arange(0, d_model, 2, dtype=jnp.float32) * (-math.log(10000.0) / d_model)
    )
    pe = jnp.zeros((max_len, d_model), jnp.float32)
    pe = pe.at[:, 0::2].set(jnp.sin(pos * div))
    pe = pe.at[:, 1::2].set(jnp.cos(pos * div))
    return pe


def init_linear(key, fan_in, fan_out):
    bound = 1.0 / math.sqrt(fan_in)
    kw, kb = jax.random.split(key)
    w = jax.random.uniform(kw, (fan_in, fan_out), jnp.float32, -bound, bound)
    b = jax.random.uniform(kb, (fan_out,), jnp.float32, -bound, bound)
    return w, b


def prepare_kernel_params(tp, *, num_nodes):
    """Fold encoder Linear, PE and the 1/sqrt(H) scale into the fused q|k|v
    projection; cast MXU weights to bf16."""
    H = tp["enc_w"].shape[1]
    inv_scale = 1.0 / math.sqrt(H)
    # attention scale folded into the q third of the fused projection
    w_qkv = jnp.concatenate([tp["q_w"] * inv_scale, tp["k_w"], tp["v_w"]], axis=1)
    b_qkv = jnp.concatenate([tp["q_b"] * inv_scale, tp["k_b"], tp["v_b"]])
    pe_s = jnp.repeat(tp["pe"], num_nodes, axis=0)        # pe_s[t*N + n] = pe[t]
    # encoder Linear + PE folded in (no nonlinearity between the two Linears)
    w_comb = jnp.dot(tp["enc_w"], w_qkv)                               # (D, 3*HH)
    add_comb = jnp.dot(tp["enc_b"][None, :] + pe_s, w_qkv) + b_qkv[None, :]
    return dict(
        w_comb=w_comb.astype(jnp.bfloat16),
        add_comb=add_comb,                                             # (S, 3*HH) f32
        out_w=tp["out_w"].astype(jnp.bfloat16),
        out_b=tp["out_b"].reshape(1, -1),
    )


# ----------------------------------------------------------------------------
# Pure-f32 reference mirroring the torch module structure exactly
# ----------------------------------------------------------------------------
def dstan_reference(tp, x, mask, *, num_heads, hidden_size):
    B, T, N, D = x.shape
    H = hidden_size
    xp = jnp.transpose(x, (0, 2, 1, 3))                                # (B, N, T, D)
    h = jnp.dot(xp, tp["enc_w"]) + tp["enc_b"]                         # encoder
    h = h + tp["pe"][None, None]                                       # PE over T

    def proj(w, b):
        z = (jnp.dot(h, w) + b).reshape(B, N, T, num_heads, H)
        z = jnp.transpose(z, (0, 3, 2, 1, 4))                          # (B, h, T, N, H)
        return z.reshape(B, num_heads, T * N, H)

    Q = proj(tp["q_w"], tp["q_b"])
    K = proj(tp["k_w"], tp["k_b"])
    V = proj(tp["v_w"], tp["v_b"])

    e = jnp.einsum("bhqd,bhkd->bhqk", Q, K) / math.sqrt(H)
    e = jnp.where(mask[None, None], -jnp.inf, e)
    a = jax.nn.softmax(e, axis=-1)
    # dropout(p=0.6) identity in eval mode
    o = jnp.einsum("bhqk,bhkd->bhqd", a, V)
    o = jnp.transpose(o, (0, 2, 1, 3)).reshape(B, N, T, num_heads * H)
    return jnp.dot(o, tp["out_w"]) + tp["out_b"]


# ----------------------------------------------------------------------------
if __name__ == "__main__":
    B, T, N = 2, 8, 4                 # batch, window_size (time), num_nodes
    D_in, H, heads = 4, 32, 8         # input_size, hidden_size, num_heads
    S = T * N

    root = jax.random.PRNGKey(0)
    k_enc, k_q, k_k, k_v, k_out, k_x = jax.random.split(root, 6)

    enc_w, enc_b = init_linear(k_enc, D_in, H)
    q_w, q_b = init_linear(k_q, H, H * heads)
    k_w, k_b = init_linear(k_k, H, H * heads)
    v_w, v_b = init_linear(k_v, H, H * heads)
    out_w, out_b = init_linear(k_out, H * heads, H)

    torch_params = dict(enc_w=enc_w, enc_b=enc_b, q_w=q_w, q_b=q_b,
                        k_w=k_w, k_b=k_b, v_w=v_w, v_b=v_b,
                        out_w=out_w, out_b=out_b,
                        pe=make_positional_encoding(T, H))
    kparams = prepare_kernel_params(torch_params, num_nodes=N)

    x = jax.random.normal(k_x, (B, T, N, D_in), jnp.float32)

    # Causal-in-time mask over the flattened (t, n) axis (True = masked).
    t_of_s = jnp.arange(S) // N
    mask = t_of_s[None, :] > t_of_s[:, None]                           # (S, S) bool

    fwd = jax.jit(functools.partial(dstan_forward, num_heads=heads,
                                    hidden_size=H))
    out = jax.block_until_ready(fwd(kparams, x, mask))
    assert out.shape == (B, N, T, H)
    assert bool(jnp.all(jnp.isfinite(out)))

    ref = dstan_reference(torch_params, x, mask, num_heads=heads, hidden_size=H)
    err = float(jnp.max(jnp.abs(out - ref)))
    # bf16 MXU weights/activations + fused-projection reordering vs f32 reference
    assert err < 5e-2, f"max abs error vs f32 reference: {err}"

    print("KERNEL_OK")
</pallas_src>

<mosaic_0001>
module attributes {stable_mosaic.version = 11 : i64} {
  func.func @_dstan_fused_kernel(%arg0: i32, %arg1: memref<1x32x4xf32, #tpu.memory_space<vmem>>, %arg2: memref<4x768xbf16, #tpu.memory_space<vmem>>, %arg3: memref<32x768xf32, #tpu.memory_space<vmem>>, %arg4: memref<32x32xf32, #tpu.memory_space<vmem>>, %arg5: memref<256x32xbf16, #tpu.memory_space<vmem>>, %arg6: memref<1x32xf32, #tpu.memory_space<vmem>>, %arg7: memref<1x32x32xf32, #tpu.memory_space<vmem>>) attributes {dimension_semantics = [#tpu.dimension_semantics<parallel>], iteration_bounds = array<i64: 2>, scalar_prefetch = 0 : i64, scratch_operands = 0 : i64, tpu.core_type = #tpu.core_type<tc>, window_params = [{transform_indices = @transform_0, window_bounds = array<i64: 1, 32, 4>}, {pipeline_mode = #tpu.pipeline_mode<synchronous>, transform_indices = @transform_1, window_bounds = array<i64: 4, 768>}, {pipeline_mode = #tpu.pipeline_mode<synchronous>, transform_indices = @transform_2, window_bounds = array<i64: 32, 768>}, {pipeline_mode = #tpu.pipeline_mode<synchronous>, transform_indices = @transform_3, window_bounds = array<i64: 32, 32>}, {pipeline_mode = #tpu.pipeline_mode<synchronous>, transform_indices = @transform_4, window_bounds = array<i64: 256, 32>}, {pipeline_mode = #tpu.pipeline_mode<synchronous>, transform_indices = @transform_5, window_bounds = array<i64: 1, 32>}, {transform_indices = @transform_6, window_bounds = array<i64: 1, 32, 32>}]} {
    %c0 = arith.constant 0 : index
    %c0_0 = arith.constant 0 : index
    %c0_1 = arith.constant 0 : index
    %0 = vector.load %arg1[%c0, %c0_0, %c0_1] : memref<1x32x4xf32, #tpu.memory_space<vmem>>, vector<1x32x4xf32>
    %1 = vector.shape_cast %0 : vector<1x32x4xf32> to vector<32x4xf32>
    %2 = arith.truncf %1 : vector<32x4xf32> to vector<32x4xbf16>
    %c0_2 = arith.constant 0 : index
    %c0_3 = arith.constant 0 : index
    %3 = vector.load %arg2[%c0_2, %c0_3] : memref<4x768xbf16, #tpu.memory_space<vmem>>, vector<4x768xbf16>
    %cst = arith.constant dense<0.000000e+00> : vector<32x768xf32>
    %4 = tpu.matmul %2, %3, %cst {dimension_numbers = #tpu.dot_dimension_numbers<[1], [0], [0], [1], [0, 0, 1, 1], [], []>} : vector<32x4xbf16>, vector<4x768xbf16>, vector<32x768xf32> -> vector<32x768xf32>
    %c0_4 = arith.constant 0 : index
    %c0_5 = arith.constant 0 : index
    %5 = vector.load %arg3[%c0_4, %c0_5] : memref<32x768xf32, #tpu.memory_space<vmem>>, vector<32x768xf32>
    %6 = arith.addf %4, %5 : vector<32x768xf32>
    %7 = arith.truncf %6 : vector<32x768xf32> to vector<32x768xbf16>
    %c0_6 = arith.constant 0 : index
    %c0_7 = arith.constant 0 : index
    %8 = vector.load %arg4[%c0_6, %c0_7] : memref<32x32xf32, #tpu.memory_space<vmem>>, vector<32x32xf32>
    %c0_8 = arith.constant 0 : index
    %c0_9 = arith.constant 0 : index
    %9 = vector.load %arg6[%c0_8, %c0_9] : memref<1x32xf32, #tpu.memory_space<vmem>>, vector<1x32xf32>
    %10 = vector.extract_strided_slice %7 {offsets = [0, 0], sizes = [32, 32], strides = [1, 1]} : vector<32x768xbf16> to vector<32x32xbf16>
    %11 = vector.extract_strided_slice %7 {offsets = [0, 256], sizes = [32, 32], strides = [1, 1]} : vector<32x768xbf16> to vector<32x32xbf16>
    %12 = vector.extract_strided_slice %7 {offsets = [0, 512], sizes = [32, 32], strides = [1, 1]} : vector<32x768xbf16> to vector<32x32xbf16>
    %cst_10 = arith.constant dense<0.000000e+00> : vector<32x32xf32>
    %13 = tpu.matmul %10, %11, %cst_10 {dimension_numbers = #tpu.dot_dimension_numbers<[1], [1], [0], [0], [0, 0, 1, 0], [], []>} : vector<32x32xbf16>, vector<32x32xbf16>, vector<32x32xf32> -> vector<32x32xf32>
    %14 = arith.addf %13, %8 : vector<32x32xf32>
    %cst_11 = arith.constant dense<0xFF800000> : vector<32xf32>
    %15 = vector.multi_reduction <maximumf>, %14, %cst_11 [1] : vector<32x32xf32> to vector<32xf32>
    %16 = vector.shape_cast %15 : vector<32xf32> to vector<32x1xf32>
    %17 = vector.broadcast %16 : vector<32x1xf32> to vector<32x32xf32>
    %18 = arith.subf %14, %17 : vector<32x32xf32>
    %19 = math.exp %18 : vector<32x32xf32>
    %cst_12 = arith.constant dense<0.000000e+00> : vector<32xf32>
    %20 = vector.multi_reduction <add>, %19, %cst_12 [1] : vector<32x32xf32> to vector<32xf32>
    %21 = vector.shape_cast %20 : vector<32xf32> to vector<32x1xf32>
    %22 = tpu.reciprocal %21 {approx = true} : vector<32x1xf32> -> vector<32x1xf32>
    %23 = vector.broadcast %22 : vector<32x1xf32> to vector<32x32xf32>
    %24 = arith.mulf %19, %23 : vector<32x32xf32>
    %25 = arith.truncf %24 : vector<32x32xf32> to vector<32x32xbf16>
    %cst_13 = arith.constant dense<0.000000e+00> : vector<32x32xf32>
    %26 = tpu.matmul %25, %12, %cst_13 {dimension_numbers = #tpu.dot_dimension_numbers<[1], [0], [0], [1], [0, 0, 1, 1], [], []>} : vector<32x32xbf16>, vector<32x32xbf16>, vector<32x32xf32> -> vector<32x32xf32>
    %27 = arith.truncf %26 : vector<32x32xf32> to vector<32x32xbf16>
    %c0_14 = arith.constant 0 : index
    %c0_15 = arith.constant 0 : index
    %28 = vector.load %arg5[%c0_14, %c0_15] : memref<256x32xbf16, #tpu.memory_space<vmem>>, vector<32x32xbf16>
    %cst_16 = arith.constant dense<0.000000e+00> : vector<32x32xf32>
    %29 = tpu.matmul %27, %28, %cst_16 {dimension_numbers = #tpu.dot_dimension_numbers<[1], [0], [0], [1], [0, 0, 1, 1], [], []>} : vector<32x32xbf16>, vector<32x32xbf16>, vector<32x32xf32> -> vector<32x32xf32>
    %30 = vector.broadcast %9 : vector<1x32xf32> to vector<32x32xf32>
    %31 = arith.addf %30, %29 : vector<32x32xf32>
    %32 = vector.extract_strided_slice %7 {offsets = [0, 32], sizes = [32, 32], strides = [1, 1]} : vector<32x768xbf16> to vector<32x32xbf16>
    %33 = vector.extract_strided_slice %7 {offsets = [0, 288], sizes = [32, 32], strides = [1, 1]} : vector<32x768xbf16> to vector<32x32xbf16>
    %34 = vector.extract_strided_slice %7 {offsets = [0, 544], sizes = [32, 32], strides = [1, 1]} : vector<32x768xbf16> to vector<32x32xbf16>
    %cst_17 = arith.constant dense<0.000000e+00> : vector<32x32xf32>
    %35 = tpu.matmul %32, %33, %cst_17 {dimension_numbers = #tpu.dot_dimension_numbers<[1], [1], [0], [0], [0, 0, 1, 0], [], []>} : vector<32x32xbf16>, vector<32x32xbf16>, vector<32x32xf32> -> vector<32x32xf32>
    %36 = arith.addf %35, %8 : vector<32x32xf32>
    %cst_18 = arith.constant dense<0xFF800000> : vector<32xf32>
    %37 = vector.multi_reduction <maximumf>, %36, %cst_18 [1] : vector<32x32xf32> to vector<32xf32>
    %38 = vector.shape_cast %37 : vector<32xf32> to vector<32x1xf32>
    %39 = vector.broadcast %38 : vector<32x1xf32> to vector<32x32xf32>
    %40 = arith.subf %36, %39 : vector<32x32xf32>
    %41 = math.exp %40 : vector<32x32xf32>
    %cst_19 = arith.constant dense<0.000000e+00> : vector<32xf32>
    %42 = vector.multi_reduction <add>, %41, %cst_19 [1] : vector<32x32xf32> to vector<32xf32>
    %43 = vector.shape_cast %42 : vector<32xf32> to vector<32x1xf32>
    %44 = tpu.reciprocal %43 {approx = true} : vector<32x1xf32> -> vector<32x1xf32>
    %45 = vector.broadcast %44 : vector<32x1xf32> to vector<32x32xf32>
    %46 = arith.mulf %41, %45 : vector<32x32xf32>
    %47 = arith.truncf %46 : vector<32x32xf32> to vector<32x32xbf16>
    %cst_20 = arith.constant dense<0.000000e+00> : vector<32x32xf32>
    %48 = tpu.matmul %47, %34, %cst_20 {dimension_numbers = #tpu.dot_dimension_numbers<[1], [0], [0], [1], [0, 0, 1, 1], [], []>} : vector<32x32xbf16>, vector<32x32xbf16>, vector<32x32xf32> -> vector<32x32xf32>
    %49 = arith.truncf %48 : vector<32x32xf32> to vector<32x32xbf16>
    %c32 = arith.constant 32 : index
    %c0_21 = arith.constant 0 : index
    %50 = vector.load %arg5[%c32, %c0_21] : memref<256x32xbf16, #tpu.memory_space<vmem>>, vector<32x32xbf16>
    %cst_22 = arith.constant dense<0.000000e+00> : vector<32x32xf32>
    %51 = tpu.matmul %49, %50, %cst_22 {dimension_numbers = #tpu.dot_dimension_numbers<[1], [0], [0], [1], [0, 0, 1, 1], [], []>} : vector<32x32xbf16>, vector<32x32xbf16>, vector<32x32xf32> -> vector<32x32xf32>
    %52 = arith.addf %31, %51 : vector<32x32xf32>
    %53 = vector.extract_strided_slice %7 {offsets = [0, 64], sizes = [32, 32], strides = [1, 1]} : vector<32x768xbf16> to vector<32x32xbf16>
    %54 = vector.extract_strided_slice %7 {offsets = [0, 320], sizes = [32, 32], strides = [1, 1]} : vector<32x768xbf16> to vector<32x32xbf16>
    %55 = vector.extract_strided_slice %7 {offsets = [0, 576], sizes = [32, 32], strides = [1, 1]} : vector<32x768xbf16> to vector<32x32xbf16>
    %cst_23 = arith.constant dense<0.000000e+00> : vector<32x32xf32>
    %56 = tpu.matmul %53, %54, %cst_23 {dimension_numbers = #tpu.dot_dimension_numbers<[1], [1], [0], [0], [0, 0, 1, 0], [], []>} : vector<32x32xbf16>, vector<32x32xbf16>, vector<32x32xf32> -> vector<32x32xf32>
    %57 = arith.addf %56, %8 : vector<32x32xf32>
    %cst_24 = arith.constant dense<0xFF800000> : vector<32xf32>
    %58 = vector.multi_reduction <maximumf>, %57, %cst_24 [1] : vector<32x32xf32> to vector<32xf32>
    %59 = vector.shape_cast %58 : vector<32xf32> to vector<32x1xf32>
    %60 = vector.broadcast %59 : vector<32x1xf32> to vector<32x32xf32>
    %61 = arith.subf %57, %60 : vector<32x32xf32>
    %62 = math.exp %61 : vector<32x32xf32>
    %cst_25 = arith.constant dense<0.000000e+00> : vector<32xf32>
    %63 = vector.multi_reduction <add>, %62, %cst_25 [1] : vector<32x32xf32> to vector<32xf32>
    %64 = vector.shape_cast %63 : vector<32xf32> to vector<32x1xf32>
    %65 = tpu.reciprocal %64 {approx = true} : vector<32x1xf32> -> vector<32x1xf32>
    %66 = vector.broadcast %65 : vector<32x1xf32> to vector<32x32xf32>
    %67 = arith.mulf %62, %66 : vector<32x32xf32>
    %68 = arith.truncf %67 : vector<32x32xf32> to vector<32x32xbf16>
    %cst_26 = arith.constant dense<0.000000e+00> : vector<32x32xf32>
    %69 = tpu.matmul %68, %55, %cst_26 {dimension_numbers = #tpu.dot_dimension_numbers<[1], [0], [0], [1], [0, 0, 1, 1], [], []>} : vector<32x32xbf16>, vector<32x32xbf16>, vector<32x32xf32> -> vector<32x32xf32>
    %70 = arith.truncf %69 : vector<32x32xf32> to vector<32x32xbf16>
    %c64 = arith.constant 64 : index
    %c0_27 = arith.constant 0 : index
    %71 = vector.load %arg5[%c64, %c0_27] : memref<256x32xbf16, #tpu.memory_space<vmem>>, vector<32x32xbf16>
    %cst_28 = arith.constant dense<0.000000e+00> : vector<32x32xf32>
    %72 = tpu.matmul %70, %71, %cst_28 {dimension_numbers = #tpu.dot_dimension_numbers<[1], [0], [0], [1], [0, 0, 1, 1], [], []>} : vector<32x32xbf16>, vector<32x32xbf16>, vector<32x32xf32> -> vector<32x32xf32>
    %73 = arith.addf %52, %72 : vector<32x32xf32>
    %74 = vector.extract_strided_slice %7 {offsets = [0, 96], sizes = [32, 32], strides = [1, 1]} : vector<32x768xbf16> to vector<32x32xbf16>
    %75 = vector.extract_strided_slice %7 {offsets = [0, 352], sizes = [32, 32], strides = [1, 1]} : vector<32x768xbf16> to vector<32x32xbf16>
    %76 = vector.extract_strided_slice %7 {offsets = [0, 608], sizes = [32, 32], strides = [1, 1]} : vector<32x768xbf16> to vector<32x32xbf16>
    %cst_29 = arith.constant dense<0.000000e+00> : vector<32x32xf32>
    %77 = tpu.matmul %74, %75, %cst_29 {dimension_numbers = #tpu.dot_dimension_numbers<[1], [1], [0], [0], [0, 0, 1, 0], [], []>} : vector<32x32xbf16>, vector<32x32xbf16>, vector<32x32xf32> -> vector<32x32xf32>
    %78 = arith.addf %77, %8 : vector<32x32xf32>
    %cst_30 = arith.constant dense<0xFF800000> : vector<32xf32>
    %79 = vector.multi_reduction <maximumf>, %78, %cst_30 [1] : vector<32x32xf32> to vector<32xf32>
    %80 = vector.shape_cast %79 : vector<32xf32> to vector<32x1xf32>
    %81 = vector.broadcast %80 : vector<32x1xf32> to vector<32x32xf32>
    %82 = arith.subf %78, %81 : vector<32x32xf32>
    %83 = math.exp %82 : vector<32x32xf32>
    %cst_31 = arith.constant dense<0.000000e+00> : vector<32xf32>
    %84 = vector.multi_reduction <add>, %83, %cst_31 [1] : vector<32x32xf32> to vector<32xf32>
    %85 = vector.shape_cast %84 : vector<32xf32> to vector<32x1xf32>
    %86 = tpu.reciprocal %85 {approx = true} : vector<32x1xf32> -> vector<32x1xf32>
    %87 = vector.broadcast %86 : vector<32x1xf32> to vector<32x32xf32>
    %88 = arith.mulf %83, %87 : vector<32x32xf32>
    %89 = arith.truncf %88 : vector<32x32xf32> to vector<32x32xbf16>
    %cst_32 = arith.constant dense<0.000000e+00> : vector<32x32xf32>
    %90 = tpu.matmul %89, %76, %cst_32 {dimension_numbers = #tpu.dot_dimension_numbers<[1], [0], [0], [1], [0, 0, 1, 1], [], []>} : vector<32x32xbf16>, vector<32x32xbf16>, vector<32x32xf32> -> vector<32x32xf32>
    %91 = arith.truncf %90 : vector<32x32xf32> to vector<32x32xbf16>
    %c96 = arith.constant 96 : index
    %c0_33 = arith.constant 0 : index
    %92 = vector.load %arg5[%c96, %c0_33] : memref<256x32xbf16, #tpu.memory_space<vmem>>, vector<32x32xbf16>
    %cst_34 = arith.constant dense<0.000000e+00> : vector<32x32xf32>
    %93 = tpu.matmul %91, %92, %cst_34 {dimension_numbers = #tpu.dot_dimension_numbers<[1], [0], [0], [1], [0, 0, 1, 1], [], []>} : vector<32x32xbf16>, vector<32x32xbf16>, vector<32x32xf32> -> vector<32x32xf32>
    %94 = arith.addf %73, %93 : vector<32x32xf32>
    %95 = vector.extract_strided_slice %7 {offsets = [0, 128], sizes = [32, 32], strides = [1, 1]} : vector<32x768xbf16> to vector<32x32xbf16>
    %96 = vector.extract_strided_slice %7 {offsets = [0, 384], sizes = [32, 32], strides = [1, 1]} : vector<32x768xbf16> to vector<32x32xbf16>
    %97 = vector.extract_strided_slice %7 {offsets = [0, 640], sizes = [32, 32], strides = [1, 1]} : vector<32x768xbf16> to vector<32x32xbf16>
    %cst_35 = arith.constant dense<0.000000e+00> : vector<32x32xf32>
    %98 = tpu.matmul %95, %96, %cst_35 {dimension_numbers = #tpu.dot_dimension_numbers<[1], [1], [0], [0], [0, 0, 1, 0], [], []>} : vector<32x32xbf16>, vector<32x32xbf16>, vector<32x32xf32> -> vector<32x32xf32>
    %99 = arith.addf %98, %8 : vector<32x32xf32>
    %cst_36 = arith.constant dense<0xFF800000> : vector<32xf32>
    %100 = vector.multi_reduction <maximumf>, %99, %cst_36 [1] : vector<32x32xf32> to vector<32xf32>
    %101 = vector.shape_cast %100 : vector<32xf32> to vector<32x1xf32>
    %102 = vector.broadcast %101 : vector<32x1xf32> to vector<32x32xf32>
    %103 = arith.subf %99, %102 : vector<32x32xf32>
    %104 = math.exp %103 : vector<32x32xf32>
    %cst_37 = arith.constant dense<0.000000e+00> : vector<32xf32>
    %105 = vector.multi_reduction <add>, %104, %cst_37 [1] : vector<32x32xf32> to vector<32xf32>
    %106 = vector.shape_cast %105 : vector<32xf32> to vector<32x1xf32>
    %107 = tpu.reciprocal %106 {approx = true} : vector<32x1xf32> -> vector<32x1xf32>
    %108 = vector.broadcast %107 : vector<32x1xf32> to vector<32x32xf32>
    %109 = arith.mulf %104, %108 : vector<32x32xf32>
    %110 = arith.truncf %109 : vector<32x32xf32> to vector<32x32xbf16>
    %cst_38 = arith.constant dense<0.000000e+00> : vector<32x32xf32>
    %111 = tpu.matmul %110, %97, %cst_38 {dimension_numbers = #tpu.dot_dimension_numbers<[1], [0], [0], [1], [0, 0, 1, 1], [], []>} : vector<32x32xbf16>, vector<32x32xbf16>, vector<32x32xf32> -> vector<32x32xf32>
    %112 = arith.truncf %111 : vector<32x32xf32> to vector<32x32xbf16>
    %c128 = arith.constant 128 : index
    %c0_39 = arith.constant 0 : index
    %113 = vector.load %arg5[%c128, %c0_39] : memref<256x32xbf16, #tpu.memory_space<vmem>>, vector<32x32xbf16>
    %cst_40 = arith.constant dense<0.000000e+00> : vector<32x32xf32>
    %114 = tpu.matmul %112, %113, %cst_40 {dimension_numbers = #tpu.dot_dimension_numbers<[1], [0], [0], [1], [0, 0, 1, 1], [], []>} : vector<32x32xbf16>, vector<32x32xbf16>, vector<32x32xf32> -> vector<32x32xf32>
    %115 = arith.addf %94, %114 : vector<32x32xf32>
    %116 = vector.extract_strided_slice %7 {offsets = [0, 160], sizes = [32, 32], strides = [1, 1]} : vector<32x768xbf16> to vector<32x32xbf16>
    %117 = vector.extract_strided_slice %7 {offsets = [0, 416], sizes = [32, 32], strides = [1, 1]} : vector<32x768xbf16> to vector<32x32xbf16>
    %118 = vector.extract_strided_slice %7 {offsets = [0, 672], sizes = [32, 32], strides = [1, 1]} : vector<32x768xbf16> to vector<32x32xbf16>
    %cst_41 = arith.constant dense<0.000000e+00> : vector<32x32xf32>
    %119 = tpu.matmul %116, %117, %cst_41 {dimension_numbers = #tpu.dot_dimension_numbers<[1], [1], [0], [0], [0, 0, 1, 0], [], []>} : vector<32x32xbf16>, vector<32x32xbf16>, vector<32x32xf32> -> vector<32x32xf32>
    %120 = arith.addf %119, %8 : vector<32x32xf32>
    %cst_42 = arith.constant dense<0xFF800000> : vector<32xf32>
    %121 = vector.multi_reduction <maximumf>, %120, %cst_42 [1] : vector<32x32xf32> to vector<32xf32>
    %122 = vector.shape_cast %121 : vector<32xf32> to vector<32x1xf32>
    %123 = vector.broadcast %122 : vector<32x1xf32> to vector<32x32xf32>
    %124 = arith.subf %120, %123 : vector<32x32xf32>
    %125 = math.exp %124 : vector<32x32xf32>
    %cst_43 = arith.constant dense<0.000000e+00> : vector<32xf32>
    %126 = vector.multi_reduction <add>, %125, %cst_43 [1] : vector<32x32xf32> to vector<32xf32>
    %127 = vector.shape_cast %126 : vector<32xf32> to vector<32x1xf32>
    %128 = tpu.reciprocal %127 {approx = true} : vector<32x1xf32> -> vector<32x1xf32>
    %129 = vector.broadcast %128 : vector<32x1xf32> to vector<32x32xf32>
    %130 = arith.mulf %125, %129 : vector<32x32xf32>
    %131 = arith.truncf %130 : vector<32x32xf32> to vector<32x32xbf16>
    %cst_44 = arith.constant dense<0.000000e+00> : vector<32x32xf32>
    %132 = tpu.matmul %131, %118, %cst_44 {dimension_numbers = #tpu.dot_dimension_numbers<[1], [0], [0], [1], [0, 0, 1, 1], [], []>} : vector<32x32xbf16>, vector<32x32xbf16>, vector<32x32xf32> -> vector<32x32xf32>
    %133 = arith.truncf %132 : vector<32x32xf32> to vector<32x32xbf16>
    %c160 = arith.constant 160 : index
    %c0_45 = arith.constant 0 : index
    %134 = vector.load %arg5[%c160, %c0_45] : memref<256x32xbf16, #tpu.memory_space<vmem>>, vector<32x32xbf16>
    %cst_46 = arith.constant dense<0.000000e+00> : vector<32x32xf32>
    %135 = tpu.matmul %133, %134, %cst_46 {dimension_numbers = #tpu.dot_dimension_numbers<[1], [0], [0], [1], [0, 0, 1, 1], [], []>} : vector<32x32xbf16>, vector<32x32xbf16>, vector<32x32xf32> -> vector<32x32xf32>
    %136 = arith.addf %115, %135 : vector<32x32xf32>
    %137 = vector.extract_strided_slice %7 {offsets = [0, 192], sizes = [32, 32], strides = [1, 1]} : vector<32x768xbf16> to vector<32x32xbf16>
    %138 = vector.extract_strided_slice %7 {offsets = [0, 448], sizes = [32, 32], strides = [1, 1]} : vector<32x768xbf16> to vector<32x32xbf16>
    %139 = vector.extract_strided_slice %7 {offsets = [0, 704], sizes = [32, 32], strides = [1, 1]} : vector<32x768xbf16> to vector<32x32xbf16>
    %cst_47 = arith.constant dense<0.000000e+00> : vector<32x32xf32>
    %140 = tpu.matmul %137, %138, %cst_47 {dimension_numbers = #tpu.dot_dimension_numbers<[1], [1], [0], [0], [0, 0, 1, 0], [], []>} : vector<32x32xbf16>, vector<32x32xbf16>, vector<32x32xf32> -> vector<32x32xf32>
    %141 = arith.addf %140, %8 : vector<32x32xf32>
    %cst_48 = arith.constant dense<0xFF800000> : vector<32xf32>
    %142 = vector.multi_reduction <maximumf>, %141, %cst_48 [1] : vector<32x32xf32> to vector<32xf32>
    %143 = vector.shape_cast %142 : vector<32xf32> to vector<32x1xf32>
    %144 = vector.broadcast %143 : vector<32x1xf32> to vector<32x32xf32>
    %145 = arith.subf %141, %144 : vector<32x32xf32>
    %146 = math.exp %145 : vector<32x32xf32>
    %cst_49 = arith.constant dense<0.000000e+00> : vector<32xf32>
    %147 = vector.multi_reduction <add>, %146, %cst_49 [1] : vector<32x32xf32> to vector<32xf32>
    %148 = vector.shape_cast %147 : vector<32xf32> to vector<32x1xf32>
    %149 = tpu.reciprocal %148 {approx = true} : vector<32x1xf32> -> vector<32x1xf32>
    %150 = vector.broadcast %149 : vector<32x1xf32> to vector<32x32xf32>
    %151 = arith.mulf %146, %150 : vector<32x32xf32>
    %152 = arith.truncf %151 : vector<32x32xf32> to vector<32x32xbf16>
    %cst_50 = arith.constant dense<0.000000e+00> : vector<32x32xf32>
    %153 = tpu.matmul %152, %139, %cst_50 {dimension_numbers = #tpu.dot_dimension_numbers<[1], [0], [0], [1], [0, 0, 1, 1], [], []>} : vector<32x32xbf16>, vector<32x32xbf16>, vector<32x32xf32> -> vector<32x32xf32>
    %154 = arith.truncf %153 : vector<32x32xf32> to vector<32x32xbf16>
    %c192 = arith.constant 192 : index
    %c0_51 = arith.constant 0 : index
    %155 = vector.load %arg5[%c192, %c0_51] : memref<256x32xbf16, #tpu.memory_space<vmem>>, vector<32x32xbf16>
    %cst_52 = arith.constant dense<0.000000e+00> : vector<32x32xf32>
    %156 = tpu.matmul %154, %155, %cst_52 {dimension_numbers = #tpu.dot_dimension_numbers<[1], [0], [0], [1], [0, 0, 1, 1], [], []>} : vector<32x32xbf16>, vector<32x32xbf16>, vector<32x32xf32> -> vector<32x32xf32>
    %157 = arith.addf %136, %156 : vector<32x32xf32>
    %158 = vector.extract_strided_slice %7 {offsets = [0, 224], sizes = [32, 32], strides = [1, 1]} : vector<32x768xbf16> to vector<32x32xbf16>
    %159 = vector.extract_strided_slice %7 {offsets = [0, 480], sizes = [32, 32], strides = [1, 1]} : vector<32x768xbf16> to vector<32x32xbf16>
    %160 = vector.extract_strided_slice %7 {offsets = [0, 736], sizes = [32, 32], strides = [1, 1]} : vector<32x768xbf16> to vector<32x32xbf16>
    %cst_53 = arith.constant dense<0.000000e+00> : vector<32x32xf32>
    %161 = tpu.matmul %158, %159, %cst_53 {dimension_numbers = #tpu.dot_dimension_numbers<[1], [1], [0], [0], [0, 0, 1, 0], [], []>} : vector<32x32xbf16>, vector<32x32xbf16>, vector<32x32xf32> -> vector<32x32xf32>
    %162 = arith.addf %161, %8 : vector<32x32xf32>
    %cst_54 = arith.constant dense<0xFF800000> : vector<32xf32>
    %163 = vector.multi_reduction <maximumf>, %162, %cst_54 [1] : vector<32x32xf32> to vector<32xf32>
    %164 = vector.shape_cast %163 : vector<32xf32> to vector<32x1xf32>
    %165 = vector.broadcast %164 : vector<32x1xf32> to vector<32x32xf32>
    %166 = arith.subf %162, %165 : vector<32x32xf32>
    %167 = math.exp %166 : vector<32x32xf32>
    %cst_55 = arith.constant dense<0.000000e+00> : vector<32xf32>
    %168 = vector.multi_reduction <add>, %167, %cst_55 [1] : vector<32x32xf32> to vector<32xf32>
    %169 = vector.shape_cast %168 : vector<32xf32> to vector<32x1xf32>
    %170 = tpu.reciprocal %169 {approx = true} : vector<32x1xf32> -> vector<32x1xf32>
    %171 = vector.broadcast %170 : vector<32x1xf32> to vector<32x32xf32>
    %172 = arith.mulf %167, %171 : vector<32x32xf32>
    %173 = arith.truncf %172 : vector<32x32xf32> to vector<32x32xbf16>
    %cst_56 = arith.constant dense<0.000000e+00> : vector<32x32xf32>
    %174 = tpu.matmul %173, %160, %cst_56 {dimension_numbers = #tpu.dot_dimension_numbers<[1], [0], [0], [1], [0, 0, 1, 1], [], []>} : vector<32x32xbf16>, vector<32x32xbf16>, vector<32x32xf32> -> vector<32x32xf32>
    %175 = arith.truncf %174 : vector<32x32xf32> to vector<32x32xbf16>
    %c224 = arith.constant 224 : index
    %c0_57 = arith.constant 0 : index
    %176 = vector.load %arg5[%c224, %c0_57] : memref<256x32xbf16, #tpu.memory_space<vmem>>, vector<32x32xbf16>
    %cst_58 = arith.constant dense<0.000000e+00> : vector<32x32xf32>
    %177 = tpu.matmul %175, %176, %cst_58 {dimension_numbers = #tpu.dot_dimension_numbers<[1], [0], [0], [1], [0, 0, 1, 1], [], []>} : vector<32x32xbf16>, vector<32x32xbf16>, vector<32x32xf32> -> vector<32x32xf32>
    %178 = arith.addf %157, %177 : vector<32x32xf32>
    %c0_59 = arith.constant 0 : index
    %c0_60 = arith.constant 0 : index
    %c0_61 = arith.constant 0 : index
    %179 = vector.load %arg7[%c0_59, %c0_60, %c0_61] : memref<1x32x32xf32, #tpu.memory_space<vmem>>, vector<1x32x32xf32>
    %180 = vector.shape_cast %179 : vector<1x32x32xf32> to vector<32x32xf32>
    %181 = vector.shape_cast %178 : vector<32x32xf32> to vector<1x32x32xf32>
    tpu.vector_store %arg7[%c0_59, %c0_60, %c0_61], %181 {strides = array<i32>} : memref<1x32x32xf32, #tpu.memory_space<vmem>>, vector<1x32x32xf32>,
    return
  }
  func.func @transform_0(%arg0: i32) -> (i32, i32, i32) {
    %c0_i32 = arith.constant 0 : i32
    %c0_i32_0 = arith.constant 0 : i32
    %c0_i32_1 = arith.constant 0 : i32
    return %arg0, %c0_i32, %c0_i32_0 : i32, i32, i32
  }
  func.func @transform_1(%arg0: i32) -> (i32, i32) {
    %c0_i32 = arith.constant 0 : i32
    %c0_i32_0 = arith.constant 0 : i32
    %c0_i32_1 = arith.constant 0 : i32
    return %c0_i32, %c0_i32_0 : i32, i32
  }
  func.func @transform_2(%arg0: i32) -> (i32, i32) {
    %c0_i32 = arith.constant 0 : i32
    %c0_i32_0 = arith.constant 0 : i32
    %c0_i32_1 = arith.constant 0 : i32
    return %c0_i32, %c0_i32_0 : i32, i32
  }
  func.func @transform_3(%arg0: i32) -> (i32, i32) {
    %c0_i32 = arith.constant 0 : i32
    %c0_i32_0 = arith.constant 0 : i32
    %c0_i32_1 = arith.constant 0 : i32
    return %c0_i32, %c0_i32_0 : i32, i32
  }
  func.func @transform_4(%arg0: i32) -> (i32, i32) {
    %c0_i32 = arith.constant 0 : i32
    %c0_i32_0 = arith.constant 0 : i32
    %c0_i32_1 = arith.constant 0 : i32
    return %c0_i32, %c0_i32_0 : i32, i32
  }
  func.func @transform_5(%arg0: i32) -> (i32, i32) {
    %c0_i32 = arith.constant 0 : i32
    %c0_i32_0 = arith.constant 0 : i32
    %c0_i32_1 = arith.constant 0 : i32
    return %c0_i32, %c0_i32_0 : i32, i32
  }
  func.func @transform_6(%arg0: i32) -> (i32, i32, i32) {
    %c0_i32 = arith.constant 0 : i32
    %c0_i32_0 = arith.constant 0 : i32
    %c0_i32_1 = arith.constant 0 : i32
    return %arg0, %c0_i32, %c0_i32_0 : i32, i32, i32
  }
}

</mosaic_0001>

<bundles_post_ra>
// kernel: dstan_forward.1
= control target key start
LH: loop header
LB: loop body
LE: loop exit
PB: predicated region body
PF: predicated region fallthrough
CT: control target
= control target key end

     0   :  { %11 = vsyncpa [#allocation3], 0  ;;  %s3966_s0 = inlined_call_operand.vmem [shape: f32[2,32,4], index: 0, kind: input, shape index: {}]   ;;  %s3967_s1 = inlined_call_operand.vmem [shape: bf16[4,768], index: 1, kind: input, shape index: {}]   ;;  %s3968_s2 = inlined_call_operand.vmem [shape: f32[32,768], index: 2, kind: input, shape index: {}]   ;;  %s3969_s3 = inlined_call_operand.vmem [shape: f32[32,32], index: 3, kind: input, shape index: {}]   ;;  %s3970_s4 = inlined_call_operand.vmem [shape: bf16[256,32], index: 4, kind: input, shape index: {}]   ;;  %s3971_s5 = inlined_call_operand.vmem [shape: f32[1,32], index: 5, kind: input, shape index: {}]   ;;  %s3972_s6 = inlined_call_operand.hbm [shape: f32[2,32,32], index: 6, kind: output, shape index: {}]  }
   0x1   :  { %13 = vsyncpa [#allocation3 + $0x1], 0  ;;  %s3334_s21 = smov 0   ;;  %s3336_s22 = smov 0  }
   0x2   :  { %s3338_s23 = smov 0   ;;  %s3340_s24 = smov 0  }
   0x3 LB: > { %s3355_s25 = sadd.s32 4294967295, %s3289_s24   ;;  %s2607_s26 = sadd.s32 4294967294, %s3289_s24   ;;  %s3289_s24 = sphi %s3340_s24, %s3978_s24   ;;  %s3285_s23 = sphi %s3338_s23, %s3977_s23   ;;  %s3281_s22 = sphi %s3336_s22, %s3976_s22   ;;  %s3277_s21 = sphi %s3334_s21, %s3975_s21  }
   0x4   : > { %s3359_s27 = sadd.s32 1, %s3289_s24   ;;  %s157_s28 = sadd.s32 1, %s3285_s23 }
   0x5   : > { %s154_s29 = ssub.s32 %s3289_s24, %s3359_s27  ;;  %p167_p0 = scmp.ne.s32.totalorder %s3285_s23, %s3281_s22 }
   0x6   : > { %p155_p1 = scmp.eq.s32.totalorder %s154_s29, 0  ;;  %p168_p2 = scmp.eq.s32.totalorder %s3355_s25, 1 }
   0x7   : > { %p173_p3 = scmp.ne.s32.totalorder %s3281_s22, %s3277_s21  ;;  %p174_p4 = scmp.eq.s32.totalorder %s2607_s26, 1 }
   0x8   : > { %s3370_s30 = scalar_select %p155_p1, %s3285_s23, %s157_s28  }
   0x9   : > { %p3372_p5 = por %p168_p2, %p167_p0  ;;  %p3376_p6 = por %p174_p4, %p173_p3 }
   0xa   : > { %p2610_p7 = scmp.ge.s32.totalorder %s3289_s24, 1  ;;  %p215_p8 = scmp.lt.s32.totalorder %s3289_s24, 3 }
   0xc   : > { %p216_p9 = pnand %p2610_p7, %p215_p8 }
   0xd   : > { %v257_v0 = vld [vmem:[%s3967_s1] sm:$0xff] (!%p216_p9)  ;;  %v289_v1 = vlaneseq (!%p216_p9)  ;;  %p245_p10 = scmp.lt.s32.totalorder (!%p216_p9), %s3355_s25, 1  ;;  %v3291_v2 = vmov (!%p216_p9), 1983009808   ;;  %v3292_v4 = vmov (!%p216_p9), 0   ;;  %vm317_vm0 = vcmask (!%p216_p9), 1041408  }
   0xe   : > { %219 = sbr.rel (%p216_p9) target bundleno = 3461 (0xd85), region = 44  ;;  %v287_v3 = vunpack.c.l.s4 (!%p216_p9), %v3291_v2  ;;  %421 = vmatprep.mubr.bf16.mxu1 (!%p216_p9), %v3292_v4  ;;  %368 = vmatprep.mubr.bf16.mxu0 (!%p216_p9), %v3292_v4  ;;  %v285_v6 = vcombine.high (!%p216_p9), %v257_v0, %v257_v0  ;;  %vm310_vm1 = vcmask (!%p216_p9), 31744   ;;  %v259_v21 = vld [vmem:[%s3968_s2] sm:$0xff] (!%p216_p9)  ;;  %v260_v22 = vld [vmem:[%s3968_s2 + $0x8] sm:$0xff] (!%p216_p9)  ;;  %v261_v23 = vld [vmem:[%s3968_s2 + $0x10] sm:$0xff] (!%p216_p9)  ;;  %vm512_vm2 = vcmask (!%p216_p9), 261120  }
   0xf   : > { %v290_v5 = vshrl.u32 (!%p216_p9), %v289_v1, 7  ;;  %v267_v25 = vld [vmem:[%s3968_s2 + $0x40] sm:$0xff] (!%p216_p9)  ;;  %v265_v27 = vld [vmem:[%s3968_s2 + $0x30] sm:$0xff] (!%p216_p9)  ;;  %v262_v28 = vld [vmem:[%s3968_s2 + $0x18] sm:$0xff] (!%p216_p9)  ;;  %s3293_s14 = smov (!%p216_p9), 96   ;;  %s3295_s20 = smov (!%p216_p9), 32  }
  0x10   : > { %v288_v7 = vunpack.c.0.s8 (!%p216_p9), %v287_v3  ;;  %v268_v30 = vld [vmem:[%s3968_s2 + $0x48] sm:$0xff] (!%p216_p9)  ;;  %v266_v33 = vld [vmem:[%s3968_s2 + $0x38] sm:$0xff] (!%p216_p9)  ;;  %v271_v49 = vld [vmem:[%s3968_s2 + $0x60] sm:$0xff] (!%p216_p9)  ;;  %s242_s17 = sand.u32 (!%p216_p9), 1, %s3281_s22   ;;  %s2695_s29 = sshll.u32 (!%p216_p9), %s3355_s25, 9 }
  0x11   : > { %v272_v51 = vld [vmem:[%s3968_s2 + $0x68] sm:$0xff] (!%p216_p9)  ;;  %v273_v52 = vld [vmem:[%s3968_s2 + $0x70] sm:$0xff] (!%p216_p9)  ;;  %v279_v54 = vld [vmem:[%s3968_s2 + $0xa0] sm:$0xff] (!%p216_p9)  ;;  %s2611_s18 = sshll.u32 (!%p216_p9), %s242_s17, 5  ;;  %s3921_s10 = scalar_lea.hbm (!%p216_p9), %s3972_s6, %s2695_s29 }
  0x12   : > { %v291_v8 = vsub.s32 (!%p216_p9), %v288_v7, %v290_v5  ;;  %v277_v56 = vld [vmem:[%s3968_s2 + $0x90] sm:$0xff] (!%p216_p9)  ;;  %v274_v57 = vld [vmem:[%s3968_s2 + $0x78] sm:$0xff] (!%p216_p9)  ;;  %v280_v59 = vld [vmem:[%s3968_s2 + $0xa8] sm:$0xff] (!%p216_p9)  ;;  %s244_s26 = scalar_lea.vmem (!%p216_p9), [#allocation2], %s2611_s18 }
  0x13   : > { %v278_v62 = vld [vmem:[%s3968_s2 + $0x98] sm:$0xff] (!%p216_p9)  ;;  %s2545_s28 = sshll.u32 (!%p216_p9), %s244_s26, 4  ;;  %s3915_s28 = int_to_ptr.vmem [resolvable:$true] %s2545_s28 }
  0x14   : > { %v299_v10 = vrot.slane (!%p216_p9), %v285_v6, %v291_v8  ;;  %v292_v12 = vrot.slane (!%p216_p9), %v257_v0, %v291_v8 }
  0x15   : > { %s246_s11 = scalar_select %p245_p10, %s3355_s25, 1 }
  0x16   : > { %v301_v13 = vcombine.high %v299_v10, %v299_v10  ;;  %v325_v14 = vsel %vm317_vm0, %v299_v10, 0  ;;  %v300_v15 = vcombine.high %v292_v12, %v292_v12  ;;  %v319_v16 = vsel %vm317_vm0, %v292_v12, 0  ;;  %s3925_s25 = scalar_lea.sflag [#allocation3], %s242_s17 }
  0x17   : > { %s2694_s12 = sshll.u32 %s246_s11, 5  ;;  %s3227_s11 = scalar_lea.vmem %s3915_s28, 512 }
  0x18   : > { %s249_s15 = scalar_lea.vmem %s3966_s0, %s2694_s12  ;;  %2618 = vmatprep.subr.msk.bf16.mxu1 %vm317_vm0, %v301_v13  ;;  %2615 = vmatprep.subr.msk.bf16.mxu0 %vm317_vm0, %v300_v15  ;;  %p3228_p11 = scmp.ne.s32.totalorder %s3915_s28, %s3227_s11 }
  0x19   : > { %v251_v9 = vld [vmem:[%s249_s15] sm:$0xff]  ;;  %v252_v11 = vld [vmem:[%s249_s15 + $0x8] sm:$0xff]  ;;  %390 = vmatpush1.bf16.msra.mxu1 %v325_v14  ;;  %337 = vmatpush1.bf16.msra.mxu0 %v319_v16  ;;  %v253_v18 = vld [vmem:[%s249_s15 + $0x10] sm:$0xff] }
  0x1a   : > { %v3395_v17 = vpack.c.bf16 %v252_v11, %v251_v9  ;;  %v254_v19 = vld [vmem:[%s249_s15 + $0x18] sm:$0xff]  ;;  %v2614_v16 = vld.sshfl [vmem:[%s3967_s1 + $0x8] sm:$0x33 pattern:$0x76325410]  ;;  %s3294_s15 = smov 64   ;;  %p3229_p12 = pnand %p3228_p11, %p3372_p5 }
  0x1b   : > { %v3404_v20 = vpack.c.bf16 %v254_v19, %v253_v18  ;;  %v309_v18 = vcombine.high %v2614_v16, %v2614_v16  ;;  %v331_v19 = vsel %vm317_vm0, %v2614_v16, 0 }
  0x1c   : > { %2619 = vmatmul.mubr.msk.bf16.vlgmr.msra.gmra.mrb[0].mxu1 %vm310_vm1, %v3395_v17  ;;  %2616 = vmatmul.mubr.msk.bf16.vlgmr.msra.gmra.mrb[0].mxu0 %vm310_vm1, %v3395_v17  ;;  %p3230_p13 = pneg %p3229_p12 }
  0x1d   : > { %431 = vmatprep.mubr.bf16.mxu1 %v3292_v4  ;;  %378 = vmatprep.mubr.bf16.mxu0 %v3292_v4 }
  0x1e   : > { %2621 = vmatprep.subr.msk.bf16.mxu0 %vm317_vm0, %v309_v18  ;;  %v281_v18 = vld [vmem:[%s3968_s2 + $0xb0] sm:$0xff] }
  0x1f   : > { %443 = vmatpush1.bf16.msra.mxu0 %v331_v19 }
  0x24   : > { %2620 = vmatmul.mubr.msk.bf16.gmra.mrb[4].mxu1 %vm310_vm1, %v3404_v20  ;;  %2617 = vmatmul.mubr.msk.bf16.gmra.mrb[4].mxu0 %vm310_vm1, %v3404_v20 }
  0x25   : > { %474 = vmatprep.mubr.bf16.mxu0 %v3292_v4 }
  0x2c   : > { %2622 = vmatmul.mubr.msk.bf16.vlgmr.msra.gmra.mrb[8].mxu0 %vm310_vm1, %v3395_v17  ;;  %v3510_v17 = vld [vmem:[%s3969_s3 + $0x18] sm:$0xff] }
  0x2d   : > { %484 = vmatprep.mubr.bf16.mxu0 %v3292_v4 }
  0x34   : > { %2623 = vmatmul.mubr.msk.bf16.gmra.mrb[12].mxu0 %vm310_vm1, %v3404_v20  ;;  %v3516_v20 = vld [vmem:[%s3969_s3 + $0x8] sm:$0xff] }
  0xef   : > { %v423_v24 = vpop.f32.mrb[0].mxu1  ;;  %v370_v26 = vpop.f32.mrb[0].mxu0 }
  0xf0   : > { %v425_v29 = vpop.f32.mrb[1].mxu1  ;;  %v371_v31 = vadd.f32 %v370_v26, %v259_v21  ;;  %v372_v32 = vpop.f32.mrb[1].mxu0  ;;  %v424_v37 = vadd.f32 %v423_v24, %v261_v23  ;;  %v3500_v21 = vld [vmem:[%s3969_s3 + $0x10] sm:$0xff] }
  0xf1   : > { %v427_v34 = vpop.f32.mrb[2].mxu1  ;;  %v373_v35 = vadd.f32 %v372_v32, %v260_v22  ;;  %v374_v36 = vpop.f32.mrb[2].mxu0  ;;  %v426_v42 = vadd.f32 %v425_v29, %v262_v28  ;;  %v3505_v22 = vld [vmem:[%s3969_s3] sm:$0xff] }
  0xf2   : > { %v428_v38 = vadd.f32 %v427_v34, %v267_v25  ;;  %v429_v39 = vpop.f32.mrb[3].mxu1  ;;  %v375_v40 = vadd.f32 %v374_v36, %v265_v27  ;;  %v376_v41 = vpop.f32.mrb[3].mxu0  ;;  %v263_v34 = vld [vmem:[%s3968_s2 + $0x20] sm:$0xff] }
  0xf3   : > { %v430_v43 = vadd.f32 %v429_v39, %v268_v30  ;;  %v377_v44 = vadd.f32 %v376_v41, %v266_v33 }
  0xf4   : > { %v3435_v45 = vpack.c.bf16 %v428_v38, %v424_v37  ;;  %v3437_v46 = vpack.c.bf16 %v375_v40, %v371_v31  ;;  %v269_v37 = vld [vmem:[%s3968_s2 + $0x50] sm:$0xff]  ;;  %v270_v40 = vld [vmem:[%s3968_s2 + $0x58] sm:$0xff] }
  0xf5   : > { %v3439_v47 = vpack.c.bf16 %v430_v43, %v426_v42  ;;  %v3441_v48 = vpack.c.bf16 %v377_v44, %v373_v35  ;;  %v264_v35 = vld [vmem:[%s3968_s2 + $0x28] sm:$0xff] }
  0xf6   : > { %3016 = vmatprep.subr.msk.bf16.mxu1 %vm512_vm2, %v3435_v45  ;;  %v520_v50 = vsel %vm512_vm2, %v3435_v45, 0  ;;  %2796 = vmatprep.mubr.msk.bf16.mxu1 %vm512_vm2, %v3437_v46 }
  0xf7   : > { %v433_v53 = vpop.f32.mrb[4].mxu1  ;;  %2793 = vmatpush3.bf16.xpose.msra.mxu1 %v520_v50  ;;  %v380_v55 = vpop.f32.mrb[4].mxu0 }
  0xf8   : > { %v435_v58 = vpop.f32.mrb[5].mxu1  ;;  %v381_v60 = vadd.f32 %v380_v55, %v271_v49  ;;  %v382_v61 = vpop.f32.mrb[5].mxu0  ;;  %v434_v2 = vadd.f32 %v433_v53, %v273_v52 }
  0xf9   : > { %v437_v63 = vpop.f32.mrb[6].mxu1  ;;  %v383_v0 = vadd.f32 %v382_v61, %v272_v51  ;;  %v384_v1 = vpop.f32.mrb[6].mxu0  ;;  %v436_v8 = vadd.f32 %v435_v58, %v274_v57 }
  0xfa   : > { %v438_v3 = vadd.f32 %v437_v63, %v279_v54  ;;  %v439_v5 = vpop.f32.mrb[7].mxu1  ;;  %v385_v6 = vadd.f32 %v384_v1, %v277_v56  ;;  %v386_v7 = vpop.f32.mrb[7].mxu0 }
  0xfb   : > { %v440_v9 = vadd.f32 %v439_v5, %v280_v59  ;;  %v387_v10 = vadd.f32 %v386_v7, %v278_v62 }
  0xfc   : > { %v3473_v11 = vpack.c.bf16 %v438_v3, %v434_v2  ;;  %v3475_v12 = vpack.c.bf16 %v385_v6, %v381_v60 }
  0xfd   : > { %v3477_v13 = vpack.c.bf16 %v440_v9, %v436_v8  ;;  %v3479_v14 = vpack.c.bf16 %v387_v10, %v383_v0  ;;  %v275_v10 = vld [vmem:[%s3968_s2 + $0x80] sm:$0xff] }
  0xfe   : > { %3017 = vmatprep.subr.msk.bf16.mxu1 %vm512_vm2, %v3473_v11  ;;  %v523_v15 = vsel %vm512_vm2, %v3473_v11, 0 }
  0xff   : > { %2795 = vmatpush3.bf16.xpose.msra.mxu1 %v523_v15  ;;  %v476_v36 = vpop.f32.mrb[8].mxu0 }
 0x100   : > { %v477_v38 = vadd.f32 %v476_v36, %v263_v34  ;;  %v478_v39 = vpop.f32.mrb[9].mxu0 }
 0x101   : > { %v479_v41 = vadd.f32 %v478_v39, %v264_v35  ;;  %v480_v42 = vpop.f32.mrb[10].mxu0 }
 0x102   : > { %v481_v43 = vadd.f32 %v480_v42, %v269_v37  ;;  %v482_v44 = vpop.f32.mrb[11].mxu0 }
 0x103   : > { %v483_v49 = vadd.f32 %v482_v44, %v270_v40 }
 0x104   : > { %v3537_v50 = vpack.c.bf16 %v481_v43, %v477_v38 }
 0x105   : > { %v3539_v51 = vpack.c.bf16 %v483_v49, %v479_v41 }
 0x106   : > { %2797 = vmatmul.mubr.msk.bf16.vlgmr.msra.gmra.mrb[8].mxu1 %vm512_vm2, %v3475_v12  ;;  %2800 = vmatprep.subr.bf16.mxu1 %v3537_v50 }
 0x107   : > { %v486_v52 = vpop.f32.mrb[12].mxu0  ;;  %2801 = vmatpush3.bf16.msra.mxu1 %v3537_v50 }
 0x108   : > { %v487_v15 = vadd.f32 %v486_v52, %v275_v10  ;;  %v488_v16 = vpop.f32.mrb[13].mxu0 }
 0x109   : > { %v490_v19 = vpop.f32.mrb[14].mxu0 }
 0x1d9   : > { %v2798_v23 = vpop.f32.mrb[8].mxu1 }
 0x1da   : > { %v568_v4 = vadd.f32 %v2798_v23, %v3500_v21  ;;  %v559_v24 = vpop.f32.mrb[9].mxu1  ;;  %v491_v23 = vadd.f32 %v490_v19, %v281_v18 }
 0x1db   : > { %v560_v25 = vadd.f32 %v559_v24, %v3505_v22  ;;  %v2799_v26 = vpop.f32.mrb[10].mxu1  ;;  %v276_v24 = vld [vmem:[%s3968_s2 + $0x88] sm:$0xff] }
 0x1dc   : > { %v571_v27 = vadd.f32 %v2799_v26, %v3510_v17  ;;  %v562_v28 = vpop.f32.mrb[11].mxu1  ;;  %v580_v29 = vsel %vm512_vm2, %v568_v4, -inf  ;;  %v492_v26 = vpop.f32.mrb[15].mxu0 }
 0x1dd   : > { %v563_v30 = vadd.f32 %v562_v28, %v3516_v20  ;;  %581 = vmax.xlane.f32.xlu1 %v580_v29  ;;  %v574_v31 = vsel %vm512_vm2, %v560_v25, -inf }
 0x1de   : > { %575 = vmax.xlane.f32.xlu0 %v574_v31  ;;  %v583_v32 = vsel %vm512_vm2, %v571_v27, -inf }
 0x1df   : > { %v577_v33 = vsel %vm512_vm2, %v563_v30, -inf }
 0x1e1   : > { %584 = vmax.xlane.f32.xlu1 %v583_v32 }
 0x1e2   : > { %578 = vmax.xlane.f32.xlu0 %v577_v33 }
 0x26a   : > { %v582_v53 = vpop.xlane.xlu1 %581 }
 0x26b   : > { %v588_v54 = vsub.f32 %v568_v4, %v582_v53  ;;  %v576_v55 = vpop.xlane.xlu0 %575  ;;  %v3553_v4 = vpack.c.bf16 %v491_v23, %v487_v15 }
 0x26c   : > { %v586_v56 = vsub.f32 %v560_v25, %v576_v55  ;;  %v282_v25 = vld [vmem:[%s3968_s2 + $0xb8] sm:$0xff] }
 0x26d   : > { %v594_v57 = vmul.f32 1.442695, %v588_v54  ;;  %2802 = vmatprep.subr.bf16.mxu1 %v3553_v4  ;;  %v493_v28 = vadd.f32 %v492_v26, %v282_v25 }
 0x26e   : > { %v590_v58 = vmul.f32 1.442695, %v586_v56  ;;  %v585_v59 = vpop.xlane.xlu1 %584  ;;  %2803 = vmatpush3.bf16.msra.mxu1 %v3553_v4 }
 0x26f   : > { %3095 = vpow2.f32 %v594_v57  ;;  %v589_v60 = vsub.f32 %v571_v27, %v585_v59  ;;  %v579_v61 = vpop.xlane.xlu0 %578  ;;  %v489_v27 = vadd.f32 %v488_v16, %v276_v24 }
 0x270   : > { %v587_v62 = vsub.f32 %v563_v30, %v579_v61  ;;  %3097 = vpow2.f32 %v590_v58  ;;  %v3079_v30 = vld [vmem:[%s3970_s4] sm:$0xff]  }
 0x271   : > { %v596_v63 = vmul.f32 1.442695, %v589_v60  ;;  %v3563_v29 = vpack.c.bf16 %v493_v28, %v489_v27  ;;  %2808 = vmatprep.subr.bf16.mxu0 %v3079_v30 }
 0x272   : > { %v592_v0 = vmul.f32 1.442695, %v587_v62  ;;  %2809 = vmatpush3.bf16.msra.mxu0 %v3079_v30 }
 0x274   : > { %3099 = vpow2.f32 %v592_v0 }
 0x275   : > { %3101 = vpow2.f32 %v596_v63  ;;  %v3080_v63 = vld [vmem:[%s3970_s4 + $0x8] sm:$0xff]  }
 0x276   : > { %2810 = vmatprep.subr.bf16.mxu0 %v3080_v63 }
 0x277   : > { %2811 = vmatpush3.bf16.msra.mxu0 %v3080_v63 }
 0x279   : > { %v3096_v1 = vpop.eup %3095 }
 0x27a   : > { %v604_v2 = vsel %vm512_vm2, %v3096_v1, 0.0  ;;  %v3098_v3 = vpop.eup %3097 }
 0x27b   : > { %605 = vadd.xlane.f32.xlu0 %v604_v2  ;;  %v598_v6 = vsel %vm512_vm2, %v3098_v3, 0.0 }
 0x27e   : > { %v3100_v5 = vpop.eup %3099 }
 0x27f   : > { %599 = vadd.xlane.f32.xlu0 %v598_v6  ;;  %v601_v7 = vsel %vm512_vm2, %v3100_v5, 0.0  ;;  %v3102_v8 = vpop.eup %3101 }
 0x280   : > { %602 = vadd.xlane.f32.xlu1 %v601_v7  ;;  %v607_v9 = vsel %vm512_vm2, %v3102_v8, 0.0 }
 0x284   : > { %608 = vadd.xlane.f32.xlu1 %v607_v9 }
 0x295   : > { %766 = vrot.lane.b32.xlu0 %v3435_v45, %s3293_s14  ;;  %768 = vrot.lane.b32.xlu1 %v3473_v11, %s3293_s14 }
 0x299   : > { %1021 = vrot.lane.b32.xlu0 %v3435_v45, %s3294_s15  ;;  %760 = vrot.lane.b32.xlu1 %v3437_v46, %s3293_s14 }
 0x29d   : > { %1017 = vrot.lane.b32.xlu0 %v3437_v46, %s3294_s15  ;;  %762 = vrot.lane.b32.xlu1 %v3475_v12, %s3293_s14 }
 0x2a1   : > { %1023 = vrot.lane.b32.xlu1 %v3473_v11, %s3294_s15 }
 0x2a5   : > { %1019 = vrot.lane.b32.xlu1 %v3475_v12, %s3294_s15 }
 0x308   : > { %v606_v31 = vpop.xlane.xlu0 %605 }
 0x30c   : > { %v600_v32 = vpop.xlane.xlu0 %599 }
 0x30d   : > { %3103 = vrcp.f32 %v600_v32  ;;  %v603_v33 = vpop.xlane.xlu1 %602 }
 0x30e   : > { %3105 = vrcp.f32 %v603_v33 }
 0x30f   : > { %3107 = vrcp.f32 %v606_v31 }
 0x310   : > { %v767_v34 = vpop.permute.xlu0 %766 }
 0x311   : > { %v609_v35 = vpop.xlane.xlu1 %608  ;;  %3018 = vmatprep.subr.msk.bf16.mxu1 %vm512_vm2, %v767_v34  ;;  %v777_v53 = vsel %vm512_vm2, %v767_v34, 0 }
 0x312   : > { %3109 = vrcp.f32 %v609_v35 }
 0x314   : > { %v1022_v56 = vpop.permute.xlu0 %1021 }
 0x315   : > { %v769_v41 = vpop.permute.xlu1 %768  ;;  %v1032_v58 = vsel %vm512_vm2, %v1022_v56, 0 }
 0x316   : > { %v780_v55 = vsel %vm512_vm2, %v769_v41, 0 }
 0x317   : > { %v3104_v36 = vpop.eup %3103 }
 0x318   : > { %v3106_v37 = vpop.eup %3105  ;;  %v614_v38 = vmul.f32 %v3104_v36, %v3098_v3  ;;  %v1018_v59 = vpop.permute.xlu0 %1017 }
 0x319   : > { %v615_v39 = vmul.f32 %v3106_v37, %v3100_v5  ;;  %v3108_v40 = vpop.eup %3107  ;;  %v761_v54 = vpop.permute.xlu1 %760 }
 0x31a   : > { %v616_v44 = vmul.f32 %v3108_v40, %v3096_v1 }
 0x31b   : > { %v618_v42 = vpack.c.bf16 %v615_v39, %v614_v38 }
 0x31c   : > { %v3110_v43 = vpop.eup %3109 }
 0x31d   : > { %v617_v49 = vmul.f32 %v3110_v43, %v3102_v8  ;;  %2804 = vmatprep.mubr.msk.bf16.mxu1 %vm512_vm2, %v618_v42  ;;  %v763_v57 = vpop.permute.xlu1 %762 }
 0x31f   : > { %v619_v52 = vpack.c.bf16 %v617_v49, %v616_v44 }
 0x321   : > { %2805 = vmatmul.mubr.msk.bf16.vlgmr.msra.gmra.mrb[12].mxu1 %vm512_vm2, %v619_v52  ;;  %v1024_v60 = vpop.permute.xlu1 %1023 }
 0x322   : > { %2817 = vmatpush3.bf16.xpose.msra.mxu1 %v777_v53  ;;  %2820 = vmatprep.mubr.msk.bf16.mxu1 %vm512_vm2, %v761_v54  ;;  %v1035_v61 = vsel %vm512_vm2, %v1024_v60, 0 }
 0x323   : > { %3019 = vmatprep.subr.msk.bf16.mxu1 %vm512_vm2, %v769_v41 }
 0x325   : > { %v1020_v62 = vpop.permute.xlu1 %1019 }
 0x32a   : > { %2819 = vmatpush3.bf16.xpose.msra.mxu1 %v780_v55 }
 0x32b   : > { %3020 = vmatprep.subr.msk.bf16.mxu1 %vm512_vm2, %v1022_v56 }
 0x331   : > { %2821 = vmatmul.mubr.msk.bf16.vlgmr.msra.gmra.mrb[16].mxu1 %vm512_vm2, %v763_v57 }
 0x332   : > { %2841 = vmatpush3.bf16.xpose.msra.mxu1 %v1032_v58  ;;  %2844 = vmatprep.mubr.msk.bf16.mxu1 %vm512_vm2, %v1018_v59 }
 0x333   : > { %3021 = vmatprep.subr.msk.bf16.mxu1 %vm512_vm2, %v1024_v60 }
 0x33a   : > { %2843 = vmatpush3.bf16.xpose.msra.mxu1 %v1035_v61 }
 0x341   : > { %2845 = vmatmul.mubr.msk.bf16.vlgmr.msra.gmra.mrb[20].mxu1 %vm512_vm2, %v1020_v62 }
 0x3f4   : > { %v2806_v0 = vpop.f32.mrb[12].mxu1 }
 0x3f5   : > { %v660_v1 = vpop.f32.mrb[13].mxu1 }
 0x3f6   : > { %v2807_v2 = vpop.f32.mrb[14].mxu1 }
 0x3f7   : > { %v676_v3 = vpack.c.bf16 %v2807_v2, %v2806_v0  ;;  %v663_v5 = vpop.f32.mrb[15].mxu1 }
 0x3f8   : > { %v675_v6 = vpack.c.bf16 %v663_v5, %v660_v1 }
 0x3fa   : > { %2812 = vmatprep.mubr.msk.bf16.mxu0 %vm512_vm2, %v675_v6 }
 0x3fb   : > { %2813 = vmatmul.mubr.msk.bf16.vlgmr.msra.gmra.mrb[16].mxu0 %vm512_vm2, %v676_v3 }
 0x404   : > { %v2822_v7 = vpop.f32.mrb[16].mxu1 }
 0x405   : > { %v816_v8 = vpop.f32.mrb[17].mxu1  ;;  %v825_v16 = vadd.f32 %v2822_v7, %v3500_v21 }
 0x406   : > { %v817_v9 = vadd.f32 %v816_v8, %v3505_v22  ;;  %v2823_v10 = vpop.f32.mrb[18].mxu1 }
 0x407   : > { %v819_v15 = vpop.f32.mrb[19].mxu1  ;;  %v828_v24 = vadd.f32 %v2823_v10, %v3510_v17  ;;  %v837_v25 = vsel %vm512_vm2, %v825_v16, -inf }
 0x408   : > { %v820_v18 = vadd.f32 %v819_v15, %v3516_v20  ;;  %v831_v19 = vsel %vm512_vm2, %v817_v9, -inf }
 0x409   : > { %832 = vmax.xlane.f32.xlu0 %v831_v19  ;;  %v840_v26 = vsel %vm512_vm2, %v828_v24, -inf }
 0x40a   : > { %v834_v23 = vsel %vm512_vm2, %v820_v18, -inf }
 0x40b   : > { %835 = vmax.xlane.f32.xlu1 %v834_v23 }
 0x40d   : > { %838 = vmax.xlane.f32.xlu0 %v837_v25 }
 0x411   : > { %841 = vmax.xlane.f32.xlu0 %v840_v26 }
 0x414   : > { %v2846_v27 = vpop.f32.mrb[20].mxu1 }
 0x415   : > { %v1071_v28 = vpop.f32.mrb[21].mxu1  ;;  %v1080_v59 = vadd.f32 %v2846_v27, %v3500_v21 }
 0x416   : > { %v2847_v30 = vpop.f32.mrb[22].mxu1  ;;  %v1072_v58 = vadd.f32 %v1071_v28, %v3505_v22 }
 0x417   : > { %v1074_v31 = vpop.f32.mrb[23].mxu1  ;;  %v3631_v61 = vadd.f32 %v2847_v30, %v3510_v17  ;;  %v1530_v30 = vsel %vm512_vm2, %v3439_v47, 0 }
 0x418   : > { %v1086_v60 = vsel %vm512_vm2, %v1072_v58, -inf }
 0x496   : > { %v833_v32 = vpop.xlane.xlu0 %832 }
 0x497   : > { %v843_v33 = vsub.f32 %v817_v9, %v833_v32 }
 0x498   : > { %v836_v34 = vpop.xlane.xlu1 %835 }
 0x499   : > { %v847_v37 = vmul.f32 1.442695, %v843_v33  ;;  %v844_v38 = vsub.f32 %v820_v18, %v836_v34 }
 0x49a   : > { %v839_v35 = vpop.xlane.xlu0 %838 }
 0x49b   : > { %v845_v36 = vsub.f32 %v825_v16, %v839_v35  ;;  %v849_v42 = vmul.f32 1.442695, %v844_v38 }
 0x49d   : > { %v851_v39 = vmul.f32 1.442695, %v845_v36 }
 0x49e   : > { %v842_v40 = vpop.xlane.xlu0 %841 }
 0x49f   : > { %3111 = vpow2.f32 %v851_v39  ;;  %v846_v41 = vsub.f32 %v828_v24, %v842_v40 }
 0x4a0   : > { %3113 = vpow2.f32 %v847_v37 }
 0x4a1   : > { %v853_v43 = vmul.f32 1.442695, %v846_v41 }
 0x4a3   : > { %3115 = vpow2.f32 %v853_v43 }
 0x4a4   : > { %3117 = vpow2.f32 %v849_v42 }
 0x4a9   : > { %v3112_v44 = vpop.eup %3111 }
 0x4aa   : > { %v861_v49 = vsel %vm512_vm2, %v3112_v44, 0.0  ;;  %v3114_v52 = vpop.eup %3113 }
 0x4ab   : > { %862 = vadd.xlane.f32.xlu0 %v861_v49  ;;  %v855_v54 = vsel %vm512_vm2, %v3114_v52, 0.0 }
 0x4ad   : > { %v3116_v53 = vpop.eup %3115 }
 0x4ae   : > { %v864_v55 = vsel %vm512_vm2, %v3116_v53, 0.0  ;;  %v3118_v56 = vpop.eup %3117 }
 0x4af   : > { %856 = vadd.xlane.f32.xlu0 %v855_v54  ;;  %865 = vadd.xlane.f32.xlu1 %v864_v55  ;;  %v858_v57 = vsel %vm512_vm2, %v3118_v56, 0.0 }
 0x4b3   : > { %859 = vadd.xlane.f32.xlu1 %v858_v57 }
 0x4c4   : > { %881 = vrot.lane.b32.xlu1 %v3553_v4, %s3293_s14 }
 0x4c5   : > { %879 = vrot.lane.b32.xlu0 %v3537_v50, %s3293_s14 }
 0x4c8   : > { %1274 = vrot.lane.b32.xlu1 %v3435_v45, %s3295_s20  ;;  %v1092_v45 = vsel %vm512_vm2, %v1080_v59, -inf }
 0x4c9   : > { %1270 = vrot.lane.b32.xlu0 %v3437_v46, %s3295_s20  ;;  %v3635_v46 = vadd.f32 %v1074_v31, %v3516_v20  ;;  %v1533_v31 = vsel %vm512_vm2, %v3477_v13, 0 }
 0x4cc   : > { %1276 = vrot.lane.b32.xlu1 %v3473_v11, %s3295_s20  ;;  %v1095_v11 = vsel %vm512_vm2, %v3631_v61, -inf }
 0x4d0   : > { %1272 = vrot.lane.b32.xlu1 %v3475_v12, %s3295_s20  ;;  %v1089_v12 = vsel %vm512_vm2, %v3635_v46, -inf }
 0x4e8   : > { %1087 = vmax.xlane.f32.xlu0 %v1086_v60 }
 0x4ec   : > { %1093 = vmax.xlane.f32.xlu0 %v1092_v45 }
 0x4f0   : > { %1096 = vmax.xlane.f32.xlu0 %v1095_v11 }
 0x4f4   : > { %1090 = vmax.xlane.f32.xlu1 %v1089_v12 }
 0x538   : > { %v863_v62 = vpop.xlane.xlu0 %862 }
 0x53c   : > { %v866_v63 = vpop.xlane.xlu1 %865  ;;  %v857_v0 = vpop.xlane.xlu0 %856 }
 0x53d   : > { %3119 = vrcp.f32 %v866_v63 }
 0x53e   : > { %3121 = vrcp.f32 %v857_v0 }
 0x53f   : > { %3123 = vrcp.f32 %v863_v62 }
 0x540   : > { %v860_v1 = vpop.xlane.xlu1 %859  ;;  %v880_v2 = vpop.permute.xlu0 %879 }
 0x541   : > { %3125 = vrcp.f32 %v860_v1  ;;  %2824 = vmatprep.subr.bf16.mxu0 %v880_v2 }
 0x542   : > { %2825 = vmatpush3.bf16.msra.mxu0 %v880_v2 }
 0x544   : > { %v882_v3 = vpop.permute.xlu1 %881  ;;  %v1271_v5 = vpop.permute.xlu0 %1270 }
 0x545   : > { %2826 = vmatprep.subr.bf16.mxu0 %v882_v3  ;;  %2868 = vmatprep.mubr.msk.bf16.mxu1 %vm512_vm2, %v1271_v5 }
 0x546   : > { %2827 = vmatpush3.bf16.msra.mxu0 %v882_v3 }
 0x547   : > { %v3120_v6 = vpop.eup %3119 }
 0x548   : > { %v1275_v7 = vpop.permute.xlu1 %1274  ;;  %v3122_v8 = vpop.eup %3121  ;;  %v874_v16 = vmul.f32 %v3120_v6, %v3116_v53 }
 0x549   : > { %v1285_v9 = vsel %vm512_vm2, %v1275_v7, 0  ;;  %3022 = vmatprep.subr.msk.bf16.mxu1 %vm512_vm2, %v1275_v7  ;;  %v3124_v10 = vpop.eup %3123  ;;  %v871_v19 = vmul.f32 %v3122_v8, %v3114_v52 }
 0x54a   : > { %2865 = vmatpush3.bf16.xpose.msra.mxu1 %v1285_v9  ;;  %v873_v24 = vmul.f32 %v3124_v10, %v3112_v44 }
 0x54b   : > { %v3126_v15 = vpop.eup %3125 }
 0x54c   : > { %v1277_v18 = vpop.permute.xlu1 %1276  ;;  %v872_v23 = vmul.f32 %v3126_v15, %v3118_v56  ;;  %v876_v26 = vpack.c.bf16 %v874_v16, %v873_v24 }
 0x54d   : > { %3023 = vmatprep.subr.msk.bf16.mxu1 %vm512_vm2, %v1277_v18  ;;  %v1288_v27 = vsel %vm512_vm2, %v1277_v18, 0 }
 0x54e   : > { %v875_v25 = vpack.c.bf16 %v872_v23, %v871_v19 }
 0x550   : > { %2828 = vmatprep.mubr.msk.bf16.mxu0 %vm512_vm2, %v875_v25  ;;  %v1273_v28 = vpop.permute.xlu1 %1272 }
 0x551   : > { %2829 = vmatmul.mubr.msk.bf16.vlgmr.msra.gmra.mrb[20].mxu0 %vm512_vm2, %v876_v26 }
 0x552   : > { %2867 = vmatpush3.bf16.xpose.msra.mxu1 %v1288_v27 }
 0x553   : > { %3024 = vmatprep.subr.msk.bf16.mxu1 %vm512_vm2, %v3439_v47 }
 0x559   : > { %2869 = vmatmul.mubr.msk.bf16.vlgmr.msra.gmra.mrb[24].mxu1 %vm512_vm2, %v1273_v28 }
 0x55a   : > { %2889 = vmatpush3.bf16.xpose.msra.mxu1 %v1530_v30  ;;  %2892 = vmatprep.mubr.msk.bf16.mxu1 %vm512_vm2, %v3441_v48 }
 0x55b   : > { %3025 = vmatprep.subr.msk.bf16.mxu1 %vm512_vm2, %v3477_v13 }
 0x562   : > { %2891 = vmatpush3.bf16.xpose.msra.mxu1 %v1533_v31 }
 0x569   : > { %2893 = vmatmul.mubr.msk.bf16.vlgmr.msra.gmra.mrb[28].mxu1 %vm512_vm2, %v3479_v14 }
 0x575   : > { %v1088_v32 = vpop.xlane.xlu0 %1087 }
 0x576   : > { %v1098_v33 = vsub.f32 %v1072_v58, %v1088_v32  ;;  %v3081_v58 = vld [vmem:[%s3970_s4 + $0x10] sm:$0xff]  }
 0x577   : > { %2832 = vmatprep.subr.bf16.mxu0 %v3081_v58 }
 0x578   : > { %v1102_v36 = vmul.f32 1.442695, %v1098_v33  ;;  %2833 = vmatpush3.bf16.msra.mxu0 %v3081_v58 }
 0x579   : > { %v1094_v34 = vpop.xlane.xlu0 %1093 }
 0x57a   : > { %v1100_v35 = vsub.f32 %v1080_v59, %v1094_v34  ;;  %v3082_v59 = vld [vmem:[%s3970_s4 + $0x18] sm:$0xff]  }
 0x57b   : > { %2834 = vmatprep.subr.bf16.mxu0 %v3082_v59 }
 0x57c   : > { %v1106_v37 = vmul.f32 1.442695, %v1100_v35  ;;  %2835 = vmatpush3.bf16.msra.mxu0 %v3082_v59 }
 0x57d   : > { %v1097_v38 = vpop.xlane.xlu0 %1096 }
 0x57e   : > { %3127 = vpow2.f32 %v1106_v37  ;;  %v1101_v39 = vsub.f32 %v3631_v61, %v1097_v38 }
 0x57f   : > { %3129 = vpow2.f32 %v1102_v36 }
 0x580   : > { %v1108_v40 = vmul.f32 1.442695, %v1101_v39 }
 0x581   : > { %v1091_v41 = vpop.xlane.xlu1 %1090 }
 0x582   : > { %3131 = vpow2.f32 %v1108_v40  ;;  %v1099_v42 = vsub.f32 %v3635_v46, %v1091_v41  ;;  %v3083_v40 = vld [vmem:[%s3970_s4 + $0x20] sm:$0xff]   ;;  %v3084_v41 = vld [vmem:[%s3970_s4 + $0x28] sm:$0xff]  }
 0x584   : > { %v1104_v43 = vmul.f32 1.442695, %v1099_v42 }
 0x586   : > { %3133 = vpow2.f32 %v1104_v43 }
 0x588   : > { %v3128_v44 = vpop.eup %3127 }
 0x589   : > { %v1116_v49 = vsel %vm512_vm2, %v3128_v44, 0.0  ;;  %v3130_v52 = vpop.eup %3129 }
 0x58a   : > { %1117 = vadd.xlane.f32.xlu0 %v1116_v49  ;;  %v1110_v54 = vsel %vm512_vm2, %v3130_v52, 0.0 }
 0x58c   : > { %v3132_v53 = vpop.eup %3131 }
 0x58d   : > { %v1119_v55 = vsel %vm512_vm2, %v3132_v53, 0.0 }
 0x58e   : > { %1111 = vadd.xlane.f32.xlu0 %v1110_v54  ;;  %1120 = vadd.xlane.f32.xlu1 %v1119_v55 }
 0x590   : > { %v3134_v56 = vpop.eup %3133 }
 0x591   : > { %v1113_v57 = vsel %vm512_vm2, %v3134_v56, 0.0 }
 0x592   : > { %1114 = vadd.xlane.f32.xlu1 %v1113_v57 }
 0x5a3   : > { %1134 = vrot.lane.b32.xlu1 %v3553_v4, %s3294_s15 }
 0x5a4   : > { %1132 = vrot.lane.b32.xlu0 %v3537_v50, %s3294_s15 }
 0x617   : > { %v1118_v60 = vpop.xlane.xlu0 %1117 }
 0x61b   : > { %v1121_v61 = vpop.xlane.xlu1 %1120  ;;  %v1112_v45 = vpop.xlane.xlu0 %1111 }
 0x61c   : > { %3135 = vrcp.f32 %v1112_v45 }
 0x61d   : > { %3137 = vrcp.f32 %v1121_v61 }
 0x61f   : > { %v1115_v46 = vpop.xlane.xlu1 %1114  ;;  %v1133_v11 = vpop.permute.xlu0 %1132 }
 0x620   : > { %3139 = vrcp.f32 %v1115_v46  ;;  %2848 = vmatprep.subr.bf16.mxu0 %v1133_v11 }
 0x621   : > { %3141 = vrcp.f32 %v1118_v60 }
 0x623   : > { %v1135_v10 = vpop.permute.xlu1 %1134 }
 0x624   : > { %v2830_v12 = vpop.f32.mrb[20].mxu0 }
 0x625   : > { %v925_v62 = vpop.f32.mrb[21].mxu0 }
 0x626   : > { %v2831_v63 = vpop.f32.mrb[22].mxu0  ;;  %v3136_v2 = vpop.eup %3135 }
 0x627   : > { %v941_v0 = vpack.c.bf16 %v2831_v63, %v2830_v12  ;;  %v928_v1 = vpop.f32.mrb[23].mxu0  ;;  %v3138_v5 = vpop.eup %3137  ;;  %v1126_v7 = vmul.f32 %v3136_v2, %v3130_v52 }
 0x628   : > { %v940_v3 = vpack.c.bf16 %v928_v1, %v925_v62  ;;  %v1129_v16 = vmul.f32 %v3138_v5, %v3132_v53 }
 0x62a   : > { %v3140_v6 = vpop.eup %3139  ;;  %2836 = vmatprep.mubr.msk.bf16.mxu0 %vm512_vm2, %v940_v3 }
 0x62b   : > { %2837 = vmatmul.mubr.msk.bf16.vlgmr.msra.gmra.mrb[16].mxu0 %vm512_vm2, %v941_v0  ;;  %v1127_v8 = vmul.f32 %v3140_v6, %v3134_v56  ;;  %v3142_v9 = vpop.eup %3141 }
 0x62c   : > { %2849 = vmatpush3.bf16.msra.mxu0 %v1133_v11  ;;  %v2870_v15 = vpop.f32.mrb[24].mxu1  ;;  %v1128_v25 = vmul.f32 %v3142_v9, %v3128_v44 }
 0x62d   : > { %2850 = vmatprep.subr.bf16.mxu0 %v1135_v10  ;;  %v1324_v18 = vpop.f32.mrb[25].mxu1  ;;  %v1130_v19 = vpack.c.bf16 %v1127_v8, %v1126_v7  ;;  %v1333_v32 = vadd.f32 %v2870_v15, %v3500_v21 }
 0x62e   : > { %v1325_v23 = vadd.f32 %v1324_v18, %v3505_v22  ;;  %v2871_v24 = vpop.f32.mrb[26].mxu1  ;;  %v1131_v31 = vpack.c.bf16 %v1129_v16, %v1128_v25  ;;  %v3085_v25 = vld [vmem:[%s3970_s4 + $0x30] sm:$0xff]  }
 0x62f   : > { %2852 = vmatprep.mubr.msk.bf16.mxu0 %vm512_vm2, %v1130_v19  ;;  %v1327_v26 = vpop.f32.mrb[27].mxu1  ;;  %v1336_v27 = vadd.f32 %v2871_v24, %v3510_v17  ;;  %v1345_v35 = vsel %vm512_vm2, %v1333_v32, -inf }
 0x630   : > { %2851 = vmatpush3.bf16.msra.mxu0 %v1135_v10  ;;  %v1328_v28 = vadd.f32 %v1327_v26, %v3516_v20  ;;  %v1339_v30 = vsel %vm512_vm2, %v1325_v23, -inf }
 0x631   : > { %1340 = vmax.xlane.f32.xlu1 %v1339_v30  ;;  %v1348_v34 = vsel %vm512_vm2, %v1336_v27, -inf  ;;  %2856 = vmatprep.subr.bf16.mxu0 %v3083_v40 }
 0x632   : > { %v1342_v33 = vsel %vm512_vm2, %v1328_v28, -inf }
 0x633   : > { %1343 = vmax.xlane.f32.xlu0 %v1342_v33  ;;  %2853 = vmatmul.mubr.msk.bf16.vlgmr.msra.gmra.mrb[24].mxu0 %vm512_vm2, %v1131_v31 }
 0x634   : > { %2857 = vmatpush3.bf16.msra.mxu0 %v3083_v40  ;;  %v3086_v40 = vld [vmem:[%s3970_s4 + $0x38] sm:$0xff]  }
 0x635   : > { %1349 = vmax.xlane.f32.xlu1 %v1348_v34  ;;  %2858 = vmatprep.subr.bf16.mxu0 %v3084_v41 }
 0x637   : > { %1346 = vmax.xlane.f32.xlu0 %v1345_v35 }
 0x638   : > { %2859 = vmatpush3.bf16.msra.mxu0 %v3084_v41 }
 0x63c   : > { %v2894_v36 = vpop.f32.mrb[28].mxu1 }
 0x63d   : > { %v1569_v37 = vpop.f32.mrb[29].mxu1 }
 0x63e   : > { %v2895_v38 = vpop.f32.mrb[30].mxu1  ;;  %v1570_v6 = vadd.f32 %v1569_v37, %v3505_v22 }
 0x63f   : > { %v1572_v39 = vpop.f32.mrb[31].mxu1  ;;  %v3728_v9 = vadd.f32 %v2895_v38, %v3510_v17 }
 0x640   : > { %v1584_v7 = vsel %vm512_vm2, %v1570_v6, -inf  ;;  %v3725_v8 = vadd.f32 %v1572_v39, %v3516_v20 }
 0x642   : > { %v1587_v22 = vsel %vm512_vm2, %v3725_v8, -inf }
 0x6be   : > { %v1341_v42 = vpop.xlane.xlu1 %1340 }
 0x6bf   : > { %v1351_v52 = vsub.f32 %v1325_v23, %v1341_v42 }
 0x6c0   : > { %v1344_v43 = vpop.xlane.xlu0 %1343 }
 0x6c1   : > { %v1352_v44 = vsub.f32 %v1328_v28, %v1344_v43  ;;  %v1355_v58 = vmul.f32 1.442695, %v1351_v52 }
 0x6c2   : > { %v1350_v49 = vpop.xlane.xlu1 %1349 }
 0x6c3   : > { %v1354_v53 = vsub.f32 %v1336_v27, %v1350_v49  ;;  %v1357_v54 = vmul.f32 1.442695, %v1352_v44 }
 0x6c4   : > { %v1347_v55 = vpop.xlane.xlu0 %1346 }
 0x6c5   : > { %v1361_v56 = vmul.f32 1.442695, %v1354_v53  ;;  %v1353_v57 = vsub.f32 %v1333_v32, %v1347_v55 }
 0x6c7   : > { %3143 = vpow2.f32 %v1361_v56  ;;  %v1359_v59 = vmul.f32 1.442695, %v1353_v57 }
 0x6c8   : > { %3145 = vpow2.f32 %v1357_v54 }
 0x6c9   : > { %3147 = vpow2.f32 %v1359_v59 }
 0x6ca   : > { %3149 = vpow2.f32 %v1355_v58 }
 0x6d1   : > { %v3695_v60 = vpop.eup %3143 }
 0x6d2   : > { %v3697_v61 = vpop.eup %3145  ;;  %v1372_v45 = vsel %vm512_vm2, %v3695_v60, 0.0 }
 0x6d3   : > { %v3148_v46 = vpop.eup %3147  ;;  %1373 = vadd.xlane.f32.xlu1 %v1372_v45  ;;  %v1366_v62 = vsel %vm512_vm2, %v3697_v61, 0.0 }
 0x6d4   : > { %v1369_v11 = vsel %vm512_vm2, %v3148_v46, 0.0  ;;  %v3150_v12 = vpop.eup %3149 }
 0x6d5   : > { %1370 = vadd.xlane.f32.xlu0 %v1369_v11  ;;  %v1363_v63 = vsel %vm512_vm2, %v3150_v12, 0.0 }
 0x6d7   : > { %1367 = vadd.xlane.f32.xlu1 %v1366_v62 }
 0x6d9   : > { %1364 = vadd.xlane.f32.xlu0 %v1363_v63 }
 0x6e8   : > { %1387 = vrot.lane.b32.xlu1 %v3553_v4, %s3295_s20 }
 0x6ec   : > { %1770 = vrot.lane.b32.xlu1 %v3439_v47, %s3293_s14 }
 0x6ef   : > { %1385 = vrot.lane.b32.xlu0 %v3537_v50, %s3295_s20  ;;  %v3721_v50 = vadd.f32 %v2894_v36, %v3500_v21  ;;  %v1593_v21 = vsel %vm512_vm2, %v3728_v9, -inf }
 0x6f0   : > { %1772 = vrot.lane.b32.xlu1 %v3477_v13, %s3293_s14 }
 0x6f1   : > { %v1590_v10 = vsel %vm512_vm2, %v3721_v50, -inf }
 0x6f3   : > { %1764 = vrot.lane.b32.xlu0 %v3441_v48, %s3293_s14 }
 0x6f4   : > { %1766 = vrot.lane.b32.xlu1 %v3479_v14, %s3293_s14 }
 0x706   : > { %v2854_v0 = vpop.f32.mrb[24].mxu0 }
 0x707   : > { %v1178_v1 = vpop.f32.mrb[25].mxu0 }
 0x708   : > { %v2855_v2 = vpop.f32.mrb[26].mxu0 }
 0x709   : > { %v1194_v3 = vpack.c.bf16 %v2855_v2, %v2854_v0  ;;  %v1181_v4 = vpop.f32.mrb[27].mxu0 }
 0x70a   : > { %v1193_v5 = vpack.c.bf16 %v1181_v4, %v1178_v1 }
 0x70c   : > { %2860 = vmatprep.mubr.msk.bf16.mxu0 %vm512_vm2, %v1193_v5 }
 0x70d   : > { %2861 = vmatmul.mubr.msk.bf16.vlgmr.msra.gmra.mrb[16].mxu0 %vm512_vm2, %v1194_v3 }
 0x712   : > { %1585 = vmax.xlane.f32.xlu0 %v1584_v7 }
 0x716   : > { %1591 = vmax.xlane.f32.xlu0 %v1590_v10 }
 0x718   : > { %1588 = vmax.xlane.f32.xlu1 %v1587_v22 }
 0x71a   : > { %1594 = vmax.xlane.f32.xlu0 %v1593_v21 }
 0x760   : > { %v1374_v15 = vpop.xlane.xlu1 %1373 }
 0x762   : > { %v1371_v16 = vpop.xlane.xlu0 %1370 }
 0x763   : > { %3151 = vrcp.f32 %v1371_v16 }
 0x764   : > { %v1368_v20 = vpop.xlane.xlu1 %1367 }
 0x765   : > { %3153 = vrcp.f32 %v1368_v20 }
 0x766   : > { %3155 = vrcp.f32 %v1374_v15  ;;  %v1365_v17 = vpop.xlane.xlu0 %1364 }
 0x767   : > { %3157 = vrcp.f32 %v1365_v17 }
 0x768   : > { %v1388_v18 = vpop.permute.xlu1 %1387 }
 0x76a   : > { %v1386_v19 = vpop.permute.xlu0 %1385 }
 0x76b   : > { %2872 = vmatprep.subr.bf16.mxu0 %v1386_v19 }
 0x76c   : > { %v1771_v23 = vpop.permute.xlu1 %1770  ;;  %2873 = vmatpush3.bf16.msra.mxu0 %v1386_v19 }
 0x76d   : > { %v1781_v24 = vsel %vm512_vm2, %v1771_v23, 0  ;;  %2874 = vmatprep.subr.bf16.mxu0 %v1388_v18  ;;  %3026 = vmatprep.subr.msk.bf16.mxu1 %vm512_vm2, %v1771_v23  ;;  %v3152_v26 = vpop.eup %3151 }
 0x76e   : > { %2913 = vmatpush3.bf16.xpose.msra.mxu1 %v1781_v24  ;;  %v1765_v27 = vpop.permute.xlu0 %1764  ;;  %v1381_v33 = vmul.f32 %v3152_v26, %v3148_v46 }
 0x76f   : > { %v3154_v28 = vpop.eup %3153  ;;  %2916 = vmatprep.mubr.msk.bf16.mxu1 %vm512_vm2, %v1765_v27  ;;  %v3779_v27 = vld [vmem:[%s3969_s3] sm:$0xff] }
 0x770   : > { %v3156_v30 = vpop.eup %3155  ;;  %v1773_v31 = vpop.permute.xlu1 %1772  ;;  %2875 = vmatpush3.bf16.msra.mxu0 %v1388_v18  ;;  %v1380_v35 = vmul.f32 %v3154_v28, %v3697_v61 }
 0x771   : > { %v3158_v32 = vpop.eup %3157  ;;  %3027 = vmatprep.subr.msk.bf16.mxu1 %vm512_vm2, %v1773_v31  ;;  %2880 = vmatprep.subr.bf16.mxu0 %v3085_v25  ;;  %v1382_v36 = vmul.f32 %v3156_v30, %v3695_v60  ;;  %v1784_v38 = vsel %vm512_vm2, %v1773_v31, 0 }
 0x772   : > { %v1379_v34 = vmul.f32 %v3158_v32, %v3150_v12 }
 0x773   : > { %v1384_v39 = vpack.c.bf16 %v1382_v36, %v1381_v33  ;;  %v3787_v33 = vld [vmem:[%s3969_s3 + $0x10] sm:$0xff] }
 0x774   : > { %v1383_v37 = vpack.c.bf16 %v1380_v35, %v1379_v34  ;;  %v1767_v41 = vpop.permute.xlu1 %1766  ;;  %v3793_v35 = vld [vmem:[%s3969_s3 + $0x8] sm:$0xff] }
 0x776   : > { %2876 = vmatprep.mubr.msk.bf16.mxu0 %vm512_vm2, %v1383_v37  ;;  %2915 = vmatpush3.bf16.xpose.msra.mxu1 %v1784_v38 }
 0x777   : > { %2877 = vmatmul.mubr.msk.bf16.vlgmr.msra.gmra.mrb[28].mxu0 %vm512_vm2, %v1384_v39 }
 0x778   : > { %2881 = vmatpush3.bf16.msra.mxu0 %v3085_v25 }
 0x779   : > { %2882 = vmatprep.subr.bf16.mxu0 %v3086_v40 }
 0x77c   : > { %2883 = vmatpush3.bf16.msra.mxu0 %v3086_v40 }
 0x77d   : > { %2896 = vmatprep.subr.bf16.mxu0 %v3539_v51  ;;  %2917 = vmatmul.mubr.msk.bf16.vlgmr.msra.gmra.mrb[32].mxu1 %vm512_vm2, %v1767_v41 }
 0x79f   : > { %v1586_v42 = vpop.xlane.xlu0 %1585 }
 0x7a0   : > { %v1596_v43 = vsub.f32 %v1570_v6, %v1586_v42  ;;  %v3803_v42 = vld [vmem:[%s3969_s3 + $0x18] sm:$0xff] }
 0x7a2   : > { %v1600_v44 = vmul.f32 1.442695, %v1596_v43 }
 0x7a3   : > { %v1592_v49 = vpop.xlane.xlu0 %1591 }
 0x7a4   : > { %3159 = vpow2.f32 %v1600_v44  ;;  %v1598_v52 = vsub.f32 %v3721_v50, %v1592_v49 }
 0x7a5   : > { %v1589_v53 = vpop.xlane.xlu1 %1588 }
 0x7a6   : > { %v1604_v54 = vmul.f32 1.442695, %v1598_v52  ;;  %v1597_v55 = vsub.f32 %v3725_v8, %v1589_v53  ;;  %v3087_v52 = vld [vmem:[%s3970_s4 + $0x40] sm:$0xff]   ;;  %v3088_v53 = vld [vmem:[%s3970_s4 + $0x48] sm:$0xff]  }
 0x7a7   : > { %v1595_v56 = vpop.xlane.xlu0 %1594 }
 0x7a8   : > { %3161 = vpow2.f32 %v1604_v54  ;;  %v1602_v57 = vmul.f32 1.442695, %v1597_v55  ;;  %v1599_v58 = vsub.f32 %v3728_v9, %v1595_v56 }
 0x7aa   : > { %3163 = vpow2.f32 %v1602_v57  ;;  %v1606_v59 = vmul.f32 1.442695, %v1599_v58 }
 0x7ac   : > { %3165 = vpow2.f32 %v1606_v59 }
 0x7ae   : > { %v3160_v60 = vpop.eup %3159 }
 0x7af   : > { %v1608_v61 = vsel %vm512_vm2, %v3160_v60, 0.0 }
 0x7b0   : > { %1609 = vadd.xlane.f32.xlu0 %v1608_v61 }
 0x7b2   : > { %v3162_v45 = vpop.eup %3161 }
 0x7b3   : > { %v1614_v46 = vsel %vm512_vm2, %v3162_v45, 0.0 }
 0x7b4   : > { %v3164_v11 = vpop.eup %3163  ;;  %1615 = vadd.xlane.f32.xlu0 %v1614_v46 }
 0x7b5   : > { %v1611_v12 = vsel %vm512_vm2, %v3164_v11, 0.0 }
 0x7b6   : > { %v3166_v62 = vpop.eup %3165  ;;  %1612 = vadd.xlane.f32.xlu1 %v1611_v12 }
 0x7b7   : > { %v1617_v63 = vsel %vm512_vm2, %v3166_v62, 0.0 }
 0x7ba   : > { %1618 = vadd.xlane.f32.xlu1 %v1617_v63 }
 0x7ca   : > { %2025 = vrot.lane.b32.xlu0 %v3439_v47, %s3294_s15 }
 0x7cb   : > { %2027 = vrot.lane.b32.xlu1 %v3477_v13, %s3294_s15 }
 0x7cf   : > { %2021 = vrot.lane.b32.xlu1 %v3441_v48, %s3294_s15 }
 0x7d3   : > { %2023 = vrot.lane.b32.xlu1 %v3479_v14, %s3294_s15 }
 0x83d   : > { %v1610_v0 = vpop.xlane.xlu0 %1609 }
 0x83e   : > { %3167 = vrcp.f32 %v1610_v0 }
 0x841   : > { %v1616_v1 = vpop.xlane.xlu0 %1615 }
 0x843   : > { %v1613_v2 = vpop.xlane.xlu1 %1612 }
 0x844   : > { %3169 = vrcp.f32 %v1613_v2 }
 0x845   : > { %v2026_v3 = vpop.permute.xlu0 %2025  ;;  %3171 = vrcp.f32 %v1616_v1 }
 0x846   : > { %v2036_v4 = vsel %vm512_vm2, %v2026_v3, 0  ;;  %3028 = vmatprep.subr.msk.bf16.mxu1 %vm512_vm2, %v2026_v3 }
 0x847   : > { %v1619_v5 = vpop.xlane.xlu1 %1618  ;;  %2937 = vmatpush3.bf16.xpose.msra.mxu1 %v2036_v4 }
 0x848   : > { %3173 = vrcp.f32 %v1619_v5  ;;  %v3168_v8 = vpop.eup %3167 }
 0x849   : > { %v1624_v17 = vmul.f32 %v3168_v8, %v3160_v60 }
 0x84a   : > { %v2878_v6 = vpop.f32.mrb[28].mxu0 }
 0x84b   : > { %v1431_v50 = vpop.f32.mrb[29].mxu0  ;;  %v2028_v7 = vpop.permute.xlu1 %2027 }
 0x84c   : > { %v2879_v9 = vpop.f32.mrb[30].mxu0  ;;  %3029 = vmatprep.subr.msk.bf16.mxu1 %vm512_vm2, %v2028_v7  ;;  %v2039_v15 = vsel %vm512_vm2, %v2028_v7, 0 }
 0x84d   : > { %v1447_v10 = vpack.c.bf16 %v2879_v9, %v2878_v6  ;;  %v1434_v22 = vpop.f32.mrb[31].mxu0 }
 0x84e   : > { %v3170_v21 = vpop.eup %3169  ;;  %v1446_v16 = vpack.c.bf16 %v1434_v22, %v1431_v50 }
 0x84f   : > { %v2022_v20 = vpop.permute.xlu1 %2021  ;;  %2939 = vmatpush3.bf16.xpose.msra.mxu1 %v2039_v15  ;;  %v1625_v18 = vmul.f32 %v3170_v21, %v3164_v11  ;;  %v3172_v23 = vpop.eup %3171 }
 0x850   : > { %2884 = vmatprep.mubr.msk.bf16.mxu0 %vm512_vm2, %v1446_v16  ;;  %v2918_v19 = vpop.f32.mrb[32].mxu1  ;;  %2940 = vmatprep.mubr.msk.bf16.mxu1 %vm512_vm2, %v2022_v20  ;;  %v1626_v38 = vmul.f32 %v3172_v23, %v3162_v45 }
 0x851   : > { %2885 = vmatmul.mubr.msk.bf16.vlgmr.msra.gmra.mrb[16].mxu0 %vm512_vm2, %v1447_v10  ;;  %v1820_v24 = vpop.f32.mrb[33].mxu1  ;;  %v1628_v25 = vpack.c.bf16 %v1625_v18, %v1624_v17  ;;  %v1829_v34 = vadd.f32 %v3787_v33, %v2918_v19 }
 0x852   : > { %v3174_v26 = vpop.eup %3173  ;;  %2897 = vmatpush3.bf16.msra.mxu0 %v3539_v51  ;;  %v1821_v28 = vadd.f32 %v3779_v27, %v1820_v24  ;;  %v2919_v30 = vpop.f32.mrb[34].mxu1 }
 0x853   : > { %v1627_v31 = vmul.f32 %v3174_v26, %v3166_v62  ;;  %2898 = vmatprep.subr.bf16.mxu0 %v3563_v29  ;;  %v1823_v32 = vpop.f32.mrb[35].mxu1  ;;  %2900 = vmatprep.mubr.msk.bf16.mxu0 %vm512_vm2, %v1628_v25  ;;  %v2024_v39 = vpop.permute.xlu1 %2023  ;;  %v1832_v43 = vadd.f32 %v3803_v42, %v2919_v30  ;;  %v1841_v44 = vsel %vm512_vm2, %v1829_v34, -inf }
 0x854   : > { %v1824_v36 = vadd.f32 %v3793_v35, %v1823_v32  ;;  %v1835_v37 = vsel %vm512_vm2, %v1821_v28, -inf }
 0x855   : > { %1836 = vmax.xlane.f32.xlu0 %v1835_v37  ;;  %v1629_v41 = vpack.c.bf16 %v1627_v31, %v1626_v38  ;;  %v1844_v49 = vsel %vm512_vm2, %v1832_v43, -inf }
 0x856   : > { %2899 = vmatpush3.bf16.msra.mxu0 %v3563_v29  ;;  %2941 = vmatmul.mubr.msk.bf16.vlgmr.msra.gmra.mrb[36].mxu1 %vm512_vm2, %v2024_v39  ;;  %v1838_v40 = vsel %vm512_vm2, %v1824_v36, -inf }
 0x857   : > { %1839 = vmax.xlane.f32.xlu1 %v1838_v40  ;;  %2904 = vmatprep.subr.bf16.mxu0 %v3087_v52 }
 0x859   : > { %1842 = vmax.xlane.f32.xlu0 %v1841_v44  ;;  %2901 = vmatmul.mubr.msk.bf16.vlgmr.msra.gmra.mrb[32].mxu0 %vm512_vm2, %v1629_v41 }
 0x85a   : > { %2905 = vmatpush3.bf16.msra.mxu0 %v3087_v52 }
 0x85b   : > { %2906 = vmatprep.subr.bf16.mxu0 %v3088_v53 }
 0x85d   : > { %1845 = vmax.xlane.f32.xlu0 %v1844_v49 }
 0x85e   : > { %2907 = vmatpush3.bf16.msra.mxu0 %v3088_v53 }
 0x8e2   : > { %v1837_v54 = vpop.xlane.xlu0 %1836 }
 0x8e3   : > { %v1847_v55 = vsub.f32 %v1821_v28, %v1837_v54 }
 0x8e4   : > { %v1840_v56 = vpop.xlane.xlu1 %1839 }
 0x8e5   : > { %v1851_v59 = vmul.f32 1.442695, %v1847_v55  ;;  %v1848_v60 = vsub.f32 %v1824_v36, %v1840_v56 }
 0x8e6   : > { %v1843_v57 = vpop.xlane.xlu0 %1842 }
 0x8e7   : > { %v1849_v58 = vsub.f32 %v1829_v34, %v1843_v57  ;;  %v1853_v11 = vmul.f32 1.442695, %v1848_v60 }
 0x8e9   : > { %v1855_v61 = vmul.f32 1.442695, %v1849_v58 }
 0x8ea   : > { %v1846_v45 = vpop.xlane.xlu0 %1845 }
 0x8eb   : > { %3175 = vpow2.f32 %v1855_v61  ;;  %v1850_v46 = vsub.f32 %v1832_v43, %v1846_v45 }
 0x8ec   : > { %3177 = vpow2.f32 %v1851_v59 }
 0x8ed   : > { %v1857_v12 = vmul.f32 1.442695, %v1850_v46 }
 0x8ef   : > { %3179 = vpow2.f32 %v1857_v12 }
 0x8f0   : > { %3181 = vpow2.f32 %v1853_v11 }
 0x8f5   : > { %v3815_v62 = vpop.eup %3175 }
 0x8f6   : > { %v1865_v63 = vsel %vm512_vm2, %v3815_v62, 0.0  ;;  %v3819_v0 = vpop.eup %3177 }
 0x8f7   : > { %1866 = vadd.xlane.f32.xlu0 %v1865_v63  ;;  %v1859_v2 = vsel %vm512_vm2, %v3819_v0, 0.0 }
 0x8f9   : > { %v3180_v1 = vpop.eup %3179 }
 0x8fa   : > { %v1868_v3 = vsel %vm512_vm2, %v3180_v1, 0.0  ;;  %v3182_v4 = vpop.eup %3181 }
 0x8fb   : > { %1860 = vadd.xlane.f32.xlu0 %v1859_v2  ;;  %1869 = vadd.xlane.f32.xlu1 %v1868_v3  ;;  %v1862_v5 = vsel %vm512_vm2, %v3182_v4, 0.0 }
 0x8ff   : > { %1863 = vadd.xlane.f32.xlu1 %v1862_v5 }
 0x910   : > { %1885 = vrot.lane.b32.xlu1 %v3563_v29, %s3293_s14 }
 0x911   : > { %1883 = vrot.lane.b32.xlu0 %v3539_v51, %s3293_s14 }
 0x914   : > { %2278 = vrot.lane.b32.xlu1 %v3439_v47, %s3295_s20 }
 0x915   : > { %2274 = vrot.lane.b32.xlu0 %v3441_v48, %s3295_s20 }
 0x918   : > { %2280 = vrot.lane.b32.xlu1 %v3477_v13, %s3295_s20 }
 0x91c   : > { %2276 = vrot.lane.b32.xlu1 %v3479_v14, %s3295_s20 }
 0x929   : > { %v2942_v6 = vpop.f32.mrb[36].mxu1 }
 0x92a   : > { %v2075_v50 = vpop.f32.mrb[37].mxu1  ;;  %v2084_v48 = vadd.f32 %v3787_v33, %v2942_v6 }
 0x92b   : > { %v2943_v7 = vpop.f32.mrb[38].mxu1  ;;  %v2076_v21 = vadd.f32 %v3779_v27, %v2075_v50 }
 0x92c   : > { %v2902_v8 = vpop.f32.mrb[32].mxu0  ;;  %v2078_v9 = vpop.f32.mrb[39].mxu1  ;;  %v2087_v14 = vadd.f32 %v3803_v42, %v2943_v7  ;;  %v2096_v20 = vsel %vm512_vm2, %v2084_v48, -inf  ;;  %v3089_v7 = vld [vmem:[%s3970_s4 + $0x50] sm:$0xff]  }
 0x92d   : > { %v1670_v10 = vpop.f32.mrb[33].mxu0  ;;  %v2090_v13 = vsel %vm512_vm2, %v2076_v21, -inf  ;;  %v2079_v17 = vadd.f32 %v3793_v35, %v2078_v9 }
 0x92e   : > { %v2903_v22 = vpop.f32.mrb[34].mxu0  ;;  %v2099_v18 = vsel %vm512_vm2, %v2087_v14, -inf }
 0x92f   : > { %v1686_v15 = vpack.c.bf16 %v2903_v22, %v2902_v8  ;;  %v1673_v47 = vpop.f32.mrb[35].mxu0  ;;  %v2093_v19 = vsel %vm512_vm2, %v2079_v17, -inf  ;;  %v3090_v8 = vld [vmem:[%s3970_s4 + $0x58] sm:$0xff]  }
 0x930   : > { %v1685_v16 = vpack.c.bf16 %v1673_v47, %v1670_v10 }
 0x932   : > { %2908 = vmatprep.mubr.msk.bf16.mxu0 %vm512_vm2, %v1685_v16 }
 0x933   : > { %2909 = vmatmul.mubr.msk.bf16.vlgmr.msra.gmra.mrb[16].mxu0 %vm512_vm2, %v1686_v15 }
 0x934   : > { %2091 = vmax.xlane.f32.xlu0 %v2090_v13 }
 0x938   : > { %2097 = vmax.xlane.f32.xlu0 %v2096_v20 }
 0x93c   : > { %2100 = vmax.xlane.f32.xlu0 %v2099_v18 }
 0x940   : > { %2094 = vmax.xlane.f32.xlu1 %v2093_v19 }
 0x984   : > { %v1867_v23 = vpop.xlane.xlu0 %1866 }
 0x988   : > { %v1870_v24 = vpop.xlane.xlu1 %1869  ;;  %v1861_v25 = vpop.xlane.xlu0 %1860 }
 0x989   : > { %3183 = vrcp.f32 %v1870_v24 }
 0x98a   : > { %3185 = vrcp.f32 %v1861_v25 }
 0x98b   : > { %3187 = vrcp.f32 %v1867_v23 }
 0x98c   : > { %v1864_v26 = vpop.xlane.xlu1 %1863  ;;  %v1884_v28 = vpop.permute.xlu0 %1883 }
 0x98d   : > { %3189 = vrcp.f32 %v1864_v26  ;;  %2920 = vmatprep.subr.bf16.mxu0 %v1884_v28 }
 0x98e   : > { %2921 = vmatpush3.bf16.msra.mxu0 %v1884_v28 }
 0x990   : > { %v1886_v30 = vpop.permute.xlu1 %1885  ;;  %v2275_v31 = vpop.permute.xlu0 %2274 }
 0x991   : > { %2922 = vmatprep.subr.bf16.mxu0 %v1886_v30  ;;  %2964 = vmatprep.mubr.msk.bf16.mxu1 %vm512_vm2, %v2275_v31 }
 0x992   : > { %2923 = vmatpush3.bf16.msra.mxu0 %v1886_v30 }
 0x993   : > { %v3184_v32 = vpop.eup %3183  ;;  %2928 = vmatprep.subr.bf16.mxu0 %v3089_v7 }
 0x994   : > { %v2279_v34 = vpop.permute.xlu1 %2278  ;;  %v3186_v36 = vpop.eup %3185  ;;  %v1878_v40 = vmul.f32 %v3184_v32, %v3180_v1 }
 0x995   : > { %v2289_v37 = vsel %vm512_vm2, %v2279_v34, 0  ;;  %3030 = vmatprep.subr.msk.bf16.mxu1 %vm512_vm2, %v2279_v34  ;;  %v3188_v38 = vpop.eup %3187  ;;  %v1875_v43 = vmul.f32 %v3186_v36, %v3819_v0 }
 0x996   : > { %2961 = vmatpush3.bf16.xpose.msra.mxu1 %v2289_v37  ;;  %v1877_v49 = vmul.f32 %v3188_v38, %v3815_v62 }
 0x997   : > { %v3190_v39 = vpop.eup %3189 }
 0x998   : > { %v2281_v41 = vpop.permute.xlu1 %2280  ;;  %v1876_v44 = vmul.f32 %v3190_v39, %v3182_v4  ;;  %v1880_v53 = vpack.c.bf16 %v1878_v40, %v1877_v49 }
 0x999   : > { %3031 = vmatprep.subr.msk.bf16.mxu1 %vm512_vm2, %v2281_v41  ;;  %v2292_v54 = vsel %vm512_vm2, %v2281_v41, 0 }
 0x99a   : > { %v1879_v52 = vpack.c.bf16 %v1876_v44, %v1875_v43 }
 0x99c   : > { %2924 = vmatprep.mubr.msk.bf16.mxu0 %vm512_vm2, %v1879_v52  ;;  %v2277_v55 = vpop.permute.xlu1 %2276 }
 0x99d   : > { %2925 = vmatmul.mubr.msk.bf16.vlgmr.msra.gmra.mrb[36].mxu0 %vm512_vm2, %v1880_v53 }
 0x99e   : > { %2963 = vmatpush3.bf16.xpose.msra.mxu1 %v2292_v54  ;;  %2929 = vmatpush3.bf16.msra.mxu0 %v3089_v7 }
 0x99f   : > { %2930 = vmatprep.subr.bf16.mxu0 %v3090_v8 }
 0x9a2   : > { %2931 = vmatpush3.bf16.msra.mxu0 %v3090_v8 }
 0x9a5   : > { %2965 = vmatmul.mubr.msk.bf16.vlgmr.msra.gmra.mrb[40].mxu1 %vm512_vm2, %v2277_v55 }
 0x9c1   : > { %v2092_v56 = vpop.xlane.xlu0 %2091 }
 0x9c2   : > { %v2102_v57 = vsub.f32 %v2076_v21, %v2092_v56 }
 0x9c4   : > { %v2106_v60 = vmul.f32 1.442695, %v2102_v57 }
 0x9c5   : > { %v2098_v58 = vpop.xlane.xlu0 %2097 }
 0x9c6   : > { %v2104_v59 = vsub.f32 %v2084_v48, %v2098_v58 }
 0x9c8   : > { %v2110_v61 = vmul.f32 1.442695, %v2104_v59 }
 0x9c9   : > { %v2101_v45 = vpop.xlane.xlu0 %2100 }
 0x9ca   : > { %3191 = vpow2.f32 %v2110_v61  ;;  %v2105_v46 = vsub.f32 %v2087_v14, %v2101_v45 }
 0x9cb   : > { %3193 = vpow2.f32 %v2106_v60 }
 0x9cc   : > { %v2112_v11 = vmul.f32 1.442695, %v2105_v46 }
 0x9cd   : > { %v2095_v12 = vpop.xlane.xlu1 %2094 }
 0x9ce   : > { %3195 = vpow2.f32 %v2112_v11  ;;  %v2103_v62 = vsub.f32 %v2079_v17, %v2095_v12 }
 0x9d0   : > { %v2108_v63 = vmul.f32 1.442695, %v2103_v62 }
 0x9d2   : > { %3197 = vpow2.f32 %v2108_v63 }
 0x9d4   : > { %v3192_v0 = vpop.eup %3191 }
 0x9d5   : > { %v2120_v1 = vsel %vm512_vm2, %v3192_v0, 0.0  ;;  %v3194_v2 = vpop.eup %3193 }
 0x9d6   : > { %2121 = vadd.xlane.f32.xlu0 %v2120_v1  ;;  %v2114_v4 = vsel %vm512_vm2, %v3194_v2, 0.0 }
 0x9d8   : > { %v3196_v3 = vpop.eup %3195 }
 0x9d9   : > { %v2123_v5 = vsel %vm512_vm2, %v3196_v3, 0.0 }
 0x9da   : > { %2115 = vadd.xlane.f32.xlu0 %v2114_v4  ;;  %2124 = vadd.xlane.f32.xlu1 %v2123_v5 }
 0x9dc   : > { %v3198_v6 = vpop.eup %3197 }
 0x9dd   : > { %v2117_v50 = vsel %vm512_vm2, %v3198_v6, 0.0 }
 0x9de   : > { %2118 = vadd.xlane.f32.xlu1 %v2117_v50 }
 0x9ef   : > { %2138 = vrot.lane.b32.xlu1 %v3563_v29, %s3294_s15 }
 0x9f0   : > { %2136 = vrot.lane.b32.xlu0 %v3539_v51, %s3294_s15 }
 0xa63   : > { %v2122_v9 = vpop.xlane.xlu0 %2121 }
 0xa67   : > { %v2125_v10 = vpop.xlane.xlu1 %2124  ;;  %v2116_v22 = vpop.xlane.xlu0 %2115 }
 0xa68   : > { %3199 = vrcp.f32 %v2116_v22 }
 0xa69   : > { %3201 = vrcp.f32 %v2125_v10 }
 0xa6b   : > { %v2119_v21 = vpop.xlane.xlu1 %2118  ;;  %v2137_v15 = vpop.permute.xlu0 %2136 }
 0xa6c   : > { %3203 = vrcp.f32 %v2119_v21  ;;  %2944 = vmatprep.subr.bf16.mxu0 %v2137_v15 }
 0xa6d   : > { %3205 = vrcp.f32 %v2122_v9 }
 0xa6f   : > { %v2139_v26 = vpop.permute.xlu1 %2138 }
 0xa70   : > { %v2926_v47 = vpop.f32.mrb[36].mxu0 }
 0xa71   : > { %v1929_v16 = vpop.f32.mrb[37].mxu0 }
 0xa72   : > { %v2927_v48 = vpop.f32.mrb[38].mxu0  ;;  %v3200_v20 = vpop.eup %3199 }
 0xa73   : > { %v1945_v13 = vpack.c.bf16 %v2927_v48, %v2926_v47  ;;  %v1932_v14 = vpop.f32.mrb[39].mxu0  ;;  %v3202_v18 = vpop.eup %3201  ;;  %v2130_v23 = vmul.f32 %v3200_v20, %v3194_v2 }
 0xa74   : > { %v1944_v17 = vpack.c.bf16 %v1932_v14, %v1929_v16  ;;  %v2133_v30 = vmul.f32 %v3202_v18, %v3196_v3 }
 0xa76   : > { %v3204_v19 = vpop.eup %3203  ;;  %2932 = vmatprep.mubr.msk.bf16.mxu0 %vm512_vm2, %v1944_v17 }
 0xa77   : > { %2933 = vmatmul.mubr.msk.bf16.vlgmr.msra.gmra.mrb[16].mxu0 %vm512_vm2, %v1945_v13  ;;  %v2131_v24 = vmul.f32 %v3204_v19, %v3198_v6  ;;  %v3206_v25 = vpop.eup %3205 }
 0xa78   : > { %2945 = vmatpush3.bf16.msra.mxu0 %v2137_v15  ;;  %v2966_v28 = vpop.f32.mrb[40].mxu1  ;;  %v2132_v37 = vmul.f32 %v3206_v25, %v3192_v0  ;;  %v3093_v15 = vld [vmem:[%s3970_s4 + $0x70] sm:$0xff]  }
 0xa79   : > { %2946 = vmatprep.subr.bf16.mxu0 %v2139_v26  ;;  %v2328_v31 = vpop.f32.mrb[41].mxu1  ;;  %v2134_v32 = vpack.c.bf16 %v2131_v24, %v2130_v23  ;;  %v2337_v44 = vadd.f32 %v3787_v33, %v2966_v28  ;;  %v3092_v33 = vld [vmem:[%s3970_s4 + $0x68] sm:$0xff]   ;;  %v3094_v24 = vld [vmem:[%s3970_s4 + $0x78] sm:$0xff]  }
 0xa7a   : > { %v2329_v34 = vadd.f32 %v3779_v27, %v2328_v31  ;;  %v2967_v36 = vpop.f32.mrb[42].mxu1  ;;  %v2135_v43 = vpack.c.bf16 %v2133_v30, %v2132_v37 }
 0xa7b   : > { %2948 = vmatprep.mubr.msk.bf16.mxu0 %vm512_vm2, %v2134_v32  ;;  %v2331_v38 = vpop.f32.mrb[43].mxu1  ;;  %v2340_v39 = vadd.f32 %v3803_v42, %v2967_v36  ;;  %v2349_v52 = vsel %vm512_vm2, %v2337_v44, -inf }
 0xa7c   : > { %2947 = vmatpush3.bf16.msra.mxu0 %v2139_v26  ;;  %v2332_v40 = vadd.f32 %v3793_v35, %v2331_v38  ;;  %v2343_v41 = vsel %vm512_vm2, %v2329_v34, -inf  ;;  %v3091_v35 = vld [vmem:[%s3970_s4 + $0x60] sm:$0xff]  }
 0xa7d   : > { %2344 = vmax.xlane.f32.xlu1 %v2343_v41  ;;  %v2352_v27 = vsel %vm512_vm2, %v2340_v39, -inf  ;;  %2952 = vmatprep.subr.bf16.mxu0 %v3091_v35 }
 0xa7e   : > { %v2346_v49 = vsel %vm512_vm2, %v2332_v40, -inf }
 0xa7f   : > { %2347 = vmax.xlane.f32.xlu0 %v2346_v49  ;;  %2949 = vmatmul.mubr.msk.bf16.vlgmr.msra.gmra.mrb[40].mxu0 %vm512_vm2, %v2135_v43 }
 0xa80   : > { %2953 = vmatpush3.bf16.msra.mxu0 %v3091_v35 }
 0xa81   : > { %2353 = vmax.xlane.f32.xlu1 %v2352_v27  ;;  %2954 = vmatprep.subr.bf16.mxu0 %v3092_v33 }
 0xa83   : > { %2350 = vmax.xlane.f32.xlu0 %v2349_v52 }
 0xa84   : > { %2955 = vmatpush3.bf16.msra.mxu0 %v3092_v33 }
 0xb0a   : > { %v2345_v42 = vpop.xlane.xlu1 %2344 }
 0xb0b   : > { %v2355_v56 = vsub.f32 %v2329_v34, %v2345_v42  ;;  %v2632_v34 = vld [vmem:[%s3971_s5] ss:$0 sm:$0xff] }
 0xb0c   : > { %v2348_v53 = vpop.xlane.xlu0 %2347 }
 0xb0d   : > { %v2356_v54 = vsub.f32 %v2332_v40, %v2348_v53  ;;  %v2359_v45 = vmul.f32 1.442695, %v2355_v56 }
 0xb0e   : > { %v2354_v55 = vpop.xlane.xlu1 %2353 }
 0xb0f   : > { %v2358_v57 = vsub.f32 %v2340_v39, %v2354_v55  ;;  %v2361_v58 = vmul.f32 1.442695, %v2356_v54 }
 0xb10   : > { %v2351_v59 = vpop.xlane.xlu0 %2350 }
 0xb11   : > { %v2365_v60 = vmul.f32 1.442695, %v2358_v57  ;;  %v2357_v61 = vsub.f32 %v2337_v44, %v2351_v59 }
 0xb13   : > { %3207 = vpow2.f32 %v2365_v60  ;;  %v2363_v46 = vmul.f32 1.442695, %v2357_v61 }
 0xb14   : > { %3209 = vpow2.f32 %v2361_v58 }
 0xb15   : > { %3211 = vpow2.f32 %v2363_v46 }
 0xb16   : > { %3213 = vpow2.f32 %v2359_v45 }
 0xb1d   : > { %v3208_v11 = vpop.eup %3207 }
 0xb1e   : > { %v3210_v12 = vpop.eup %3209  ;;  %v2376_v62 = vsel %vm512_vm2, %v3208_v11, 0.0 }
 0xb1f   : > { %v3212_v63 = vpop.eup %3211  ;;  %2377 = vadd.xlane.f32.xlu1 %v2376_v62  ;;  %v2370_v2 = vsel %vm512_vm2, %v3210_v12, 0.0 }
 0xb20   : > { %v2373_v0 = vsel %vm512_vm2, %v3212_v63, 0.0  ;;  %v3214_v1 = vpop.eup %3213 }
 0xb21   : > { %2374 = vadd.xlane.f32.xlu0 %v2373_v0  ;;  %v2367_v3 = vsel %vm512_vm2, %v3214_v1, 0.0 }
 0xb23   : > { %2371 = vadd.xlane.f32.xlu1 %v2370_v2 }
 0xb25   : > { %2368 = vadd.xlane.f32.xlu0 %v2367_v3 }
 0xb34   : > { %2391 = vrot.lane.b32.xlu1 %v3563_v29, %s3295_s20 }
 0xb3b   : > { %2389 = vrot.lane.b32.xlu0 %v3539_v51, %s3295_s20  ;;  %s3296_s20 = smov [#allocation2]  }
 0xb3c   : > { %s3231_s12 = sshll.u32 %s3296_s20, 4  ;;  %s3232_s12 = int_to_ptr.vmem [resolvable:$false] %s3231_s12 }
 0xb3d   : > { %s3233_s13 = scalar_lea.vmem %s3232_s12, 1024  ;;  %p3234_p0 = scmp.lt.s32.totalorder %s3915_s28, %s3232_s12 }
 0xb3e   : > { %p3235_p1 = scmp.lt.s32.totalorder %s3233_s13, %s3227_s11 }
 0xb40   : > { %p3236_p2 = por %p3235_p1, %p3234_p0 }
 0xb42   : > { %p3237_p3 = pnand %p3236_p2, %p3230_p13 }
 0xb52   : > { %v2950_v4 = vpop.f32.mrb[40].mxu0 }
 0xb53   : > { %v2182_v5 = vpop.f32.mrb[41].mxu0 }
 0xb54   : > { %v2951_v6 = vpop.f32.mrb[42].mxu0 }
 0xb55   : > { %v2198_v50 = vpack.c.bf16 %v2951_v6, %v2950_v4  ;;  %v2185_v7 = vpop.f32.mrb[43].mxu0 }
 0xb56   : > { %v2197_v8 = vpack.c.bf16 %v2185_v7, %v2182_v5 }
 0xb58   : > { %2956 = vmatprep.mubr.msk.bf16.mxu0 %vm512_vm2, %v2197_v8 }
 0xb59   : > { %2957 = vmatmul.mubr.msk.bf16.vlgmr.msra.gmra.mrb[16].mxu0 %vm512_vm2, %v2198_v50 }
 0xbac   : > { %v2378_v9 = vpop.xlane.xlu1 %2377 }
 0xbae   : > { %v2375_v10 = vpop.xlane.xlu0 %2374 }
 0xbaf   : > { %3215 = vrcp.f32 %v2375_v10 }
 0xbb0   : > { %v2372_v22 = vpop.xlane.xlu1 %2371 }
 0xbb1   : > { %3217 = vrcp.f32 %v2372_v22 }
 0xbb2   : > { %3219 = vrcp.f32 %v2378_v9  ;;  %v2369_v29 = vpop.xlane.xlu0 %2368 }
 0xbb3   : > { %3221 = vrcp.f32 %v2369_v29 }
 0xbb4   : > { %v2392_v51 = vpop.permute.xlu1 %2391 }
 0xbb6   : > { %v2390_v21 = vpop.permute.xlu0 %2389 }
 0xbb7   : > { %2968 = vmatprep.subr.bf16.mxu0 %v2390_v21 }
 0xbb8   : > { %2969 = vmatpush3.bf16.msra.mxu0 %v2390_v21 }
 0xbb9   : > { %2970 = vmatprep.subr.bf16.mxu0 %v2392_v51  ;;  %v3216_v47 = vpop.eup %3215 }
 0xbba   : > { %v2385_v14 = vmul.f32 %v3216_v47, %v3212_v63 }
 0xbbb   : > { %v3218_v16 = vpop.eup %3217 }
 0xbbc   : > { %v3220_v48 = vpop.eup %3219  ;;  %2971 = vmatpush3.bf16.msra.mxu0 %v2392_v51  ;;  %v2384_v17 = vmul.f32 %v3218_v16, %v3210_v12 }
 0xbbd   : > { %v3222_v13 = vpop.eup %3221  ;;  %2976 = vmatprep.subr.bf16.mxu0 %v3093_v15  ;;  %v2386_v18 = vmul.f32 %v3220_v48, %v3208_v11 }
 0xbbe   : > { %v2383_v20 = vmul.f32 %v3222_v13, %v3214_v1 }
 0xbbf   : > { %v2388_v23 = vpack.c.bf16 %v2386_v18, %v2385_v14 }
 0xbc0   : > { %v2387_v19 = vpack.c.bf16 %v2384_v17, %v2383_v20 }
 0xbc2   : > { %2972 = vmatprep.mubr.msk.bf16.mxu0 %vm512_vm2, %v2387_v19 }
 0xbc3   : > { %2973 = vmatmul.mubr.msk.bf16.vlgmr.msra.gmra.mrb[44].mxu0 %vm512_vm2, %v2388_v23 }
 0xbc4   : > { %2977 = vmatpush3.bf16.msra.mxu0 %v3093_v15 }
 0xbc5   : > { %2978 = vmatprep.subr.bf16.mxu0 %v3094_v24 }
 0xbc8   : > { %2979 = vmatpush3.bf16.msra.mxu0 %v3094_v24 }
 0xc96   : > { %v2974_v25 = vpop.f32.mrb[44].mxu0 }
 0xc97   : > { %v2435_v26 = vpop.f32.mrb[45].mxu0 }
 0xc98   : > { %v2975_v28 = vpop.f32.mrb[46].mxu0 }
 0xc99   : > { %v2451_v30 = vpack.c.bf16 %v2975_v28, %v2974_v25  ;;  %v2438_v31 = vpop.f32.mrb[47].mxu0 }
 0xc9a   : > { %v2450_v32 = vpack.c.bf16 %v2438_v31, %v2435_v26 }
 0xc9c   : > { %2980 = vmatprep.mubr.msk.bf16.mxu0 %vm512_vm2, %v2450_v32 }
 0xc9d   : > { %2981 = vmatmul.mubr.msk.bf16.vlgmr.msra.gmra.mrb[16].mxu0 %vm512_vm2, %v2451_v30 }
 0xd70   : > { %v2982_v36 = vpop.f32.mrb[16].mxu0 }
 0xd71   : > { %v2984_v37 = vadd.f32 %v2982_v36, %v2632_v34  ;;  %v2508_v38 = vpop.f32.mrb[17].mxu0 }
 0xd72   : > { %v2985_v39 = vadd.f32 %v2632_v34, %v2508_v38  ;;  %v2983_v40 = vpop.f32.mrb[18].mxu0 }
 0xd73   : > { %2529 = vst.msk [vmem:[%s244_s26 + $0x10] sm:$0xff] %vm512_vm2, %v2984_v37  ;;  %v2986_v41 = vadd.f32 %v2983_v40, %v2632_v34  ;;  %v2511_v43 = vpop.f32.mrb[19].mxu0 }
 0xd74   : > { %2527 = vst.msk [vmem:[%s244_s26] sm:$0xff] %vm512_vm2, %v2985_v39  ;;  %v2987_v44 = vadd.f32 %v2632_v34, %v2511_v43 }
 0xd75   : > { %2530 = vst.msk [vmem:[%s244_s26 + $0x18] sm:$0xff] %vm512_vm2, %v2986_v41 }
 0xd76   : > { %2528 = vst.msk [vmem:[%s244_s26 + $0x8] sm:$0xff] %vm512_vm2, %v2987_v44 }
 0xd77   : > { %3240 = shalt.err (!%p3237_p3)
}
 0xd78   : > { %s3241_s16 = scalar_lea.hbm %s3921_s10, 512  ;;  %s3245_s19 = scalar_lea.hbm %s3972_s6, 1024 }
 0xd79   : > { %p3242_p4 = scmp.ne.s32.totalorder %s3921_s10, %s3241_s16  ;;  %p3246_p9 = scmp.lt.u32.totalorder %s3921_s10, %s3972_s6 }
 0xd7a   : > { %p3247_p10 = scmp.lt.u32.totalorder %s3245_s19, %s3241_s16  ;;  %p3249_p12 = scmp.lt.u32.totalorder %s3241_s16, %s3921_s10 }
 0xd7b   : > { %p3243_p7 = pnand %p3242_p4, %p3372_p5 }
 0xd7c   : > { %p3248_p11 = por %p3247_p10, %p3246_p9 }
 0xd7d   : > { %p3244_p8 = pneg %p3243_p7 }
 0xd7e   : > { %p3250_p13 = por %p3249_p12, %p3248_p11 }
 0xd80   : > { %p3251_p0 = pnand %p3250_p13, %p3244_p8 }
 0xd82   : > { %3254 = shalt.err (!%p3251_p0)
}
 0xd83   : > { %s3297_s29 = smov 128   ;;  %s3298_s15 = smov 8  }
 0xd84   : > { %3032 = dma.vmem_to_hbm [thread:$0]  (%p3372_p5), %s3915_s28, 512, %s3921_s10, %s3925_s25, %s3297_s29, %s3297_s29, %s3298_s15  }
 0xd85 PF: > { %p3038_p1 = scmp.ge.s32.totalorder %s3289_s24, 2  ;;  %s2560_s9 = sand.u32 1, %s3277_s21  }
 0xd86   : > { %s2561_s11 = scalar_lea.sflag [#allocation3], %s2560_s9 }
 0xd87   : > { %p3035_p2 = pnand %p3038_p1, %p3376_p6 }
 0xd89   : > { %3272 = dma.done.wait (!%p3035_p2), %s2561_s11, 512  }
 0xd8a   : > { %3274 = vsyncadd (!%p3035_p2), %s2561_s11, 4294966784  ;;  %p16_p3 = scmp.ge.s32.totalorder %s3359_s27, 4   ;;  %s3975_s21 = smov %s3281_s22 }
 0xd8b   : > { %s3976_s22 = smov %s3285_s23  ;;  %s3977_s23 = smov %s3370_s30 }
 0xd8c   : > { %s3978_s24 = smov %s3359_s27  ;;  %18 = sbr.rel (!%p16_p3) target bundleno = 3 (0x3), region = 79 }
 0xd93   :  { %2566 = vsyncpa [#allocation3], 1 }
 0xd94   :  { %2568 = vsyncpa [#allocation3 + $0x1], 1 }

</bundles_post_ra>
